<compile_context>
chip_gen: v7x
topology: tpu7x:2x2x1
jax: 0.10.0
libtpu: 0.0.40
codegen_flags: <defaults>
</compile_context>

<pallas_src>
import numpy as np
import jax
import jax.numpy as jnp
from jax.experimental import pallas as pl
from jax.experimental.pallas import tpu as pltpu

EPS = 1e-5


def _ceil8(x):
    return -(-x // 8) * 8


# ---------------------------------------------------------------------------
# Parameter helpers (deterministic synthetic init)
# ---------------------------------------------------------------------------
def init_params(key, cin, cout):
    keys = iter(jax.random.split(key, 48))

    def nrm(shape, std=0.05):
        return std * jax.random.normal(next(keys), shape, jnp.float32)

    def bn(c):
        return dict(
            gamma=1.0 + 0.1 * jax.random.normal(next(keys), (c,), jnp.float32),
            beta=0.1 * jax.random.normal(next(keys), (c,), jnp.float32),
            mean=0.05 * jax.random.normal(next(keys), (c,), jnp.float32),
            var=0.5 + jax.random.uniform(next(keys), (c,), jnp.float32),
        )

    fint, g = cout, cin // 2
    p = {}
    # EUCB: depthwise 3x3 (no bias) + BN + ReLU, then 1x1 pointwise (+bias)
    p["dwc_w"] = nrm((cin, 1, 3, 3))
    p["dwc_bn"] = bn(cin)
    p["pwc_w"] = nrm((cin, cin, 1, 1))
    p["pwc_b"] = nrm((cin,))
    # LGAG: grouped 3x3 W_g / W_x (+bias) + BN, psi 1x1 (+bias) + BN(1) + sigmoid
    p["wg_w"] = nrm((fint, cin // g, 3, 3))
    p["wg_b"] = nrm((fint,))
    p["wg_bn"] = bn(fint)
    p["wx_w"] = nrm((fint, cin // g, 3, 3))
    p["wx_b"] = nrm((fint,))
    p["wx_bn"] = bn(fint)
    p["psi_w"] = nrm((1, fint, 1, 1))
    p["psi_b"] = nrm((1,))
    p["psi_bn"] = bn(1)
    # Doubleconv: (3x3 conv + ReLU + BN) x 2
    p["dc1_w"] = nrm((cout, cin, 3, 3))
    p["dc1_b"] = nrm((cout,))
    p["dc1_bn"] = bn(cout)
    p["dc2_w"] = nrm((cout, cout, 3, 3))
    p["dc2_b"] = nrm((cout,))
    p["dc2_bn"] = bn(cout)
    return p


def _bn_affine(bn):
    s = bn["gamma"] / jnp.sqrt(bn["var"] + EPS)
    return s, bn["beta"] - bn["mean"] * s


def _grouped_to_dense(w, groups):
    """Grouped conv weight (Cout, Cin//groups, kh, kw) -> dense (Cout, Cin, kh, kw)."""
    co, cig, kh, kw = w.shape
    assert co % groups == 0
    cin = cig * groups
    cog = co // groups
    dense = jnp.zeros((co, cin, kh, kw), w.dtype)
    for g in range(groups):
        dense = dense.at[g * cog:(g + 1) * cog, g * cig:(g + 1) * cig].set(
            w[g * cog:(g + 1) * cog])
    return dense


def _conv_matrix(w_dense, cin_pad):
    """(Cout, Cin, 3, 3) -> (Cout, 9*cin_pad) matmul weights (tap-major, channel-minor)."""
    co, ci, kh, kw = w_dense.shape
    w = jnp.transpose(w_dense, (0, 2, 3, 1))              # (co, kh, kw, ci)
    w = jnp.pad(w, ((0, 0), (0, 0), (0, 0), (0, cin_pad - ci)))
    return w.reshape(co, kh * kw * cin_pad)


# ---------------------------------------------------------------------------
# Single fused decoder kernel (channel-major, zero-padded, flattened spatial layout)
# ---------------------------------------------------------------------------
def _make_decoder_kernel(CC, CM, Hd, Wd, H, W, Wp, Npad, G, offs):
    LE = Npad + 2 * G
    f32 = jnp.float32

    def kernel(xd_ref, xs_ref, up_ref, vecC_ref, wpw_ref, wgx_ref, vecF_ref,
               w1_ref, vecM_ref, w2_ref, mask_ref, o_ref,
               ext_u, ext_s, ext_d, ext_o, ext_h):
        zC = jnp.zeros((CC, LE), f32)

        # ---- stage 1: build zero-padded flattened slabs in VMEM (no HBM glue) ----
        # nearest-2x upsample: per source row, lane-duplicate via a one-hot matmul and
        # write the same row to two target rows of the padded grid.
        ext_u[...] = zC
        xdf = xd_ref[0]                                    # (CC, Hd*Wd)
        U = up_ref[...]                                    # (Wd, W)
        for y in range(Hd):
            row = jnp.dot(xdf[:, y * Wd:(y + 1) * Wd], U,
                          preferred_element_type=f32)      # (CC, W)
            b0 = G + (2 * y + 1) * Wp + 1
            b1 = G + (2 * y + 2) * Wp + 1
            ext_u[:, b0:b0 + W] = row
            ext_u[:, b1:b1 + W] = row
        # x_skip: copy rows into its padded-flattened slab.
        ext_s[...] = zC
        xsf = xs_ref[0]                                    # (CC, H*W)
        for y in range(H):
            b = G + (y + 1) * Wp + 1
            ext_s[:, b:b + W] = xsf[:, y * W:(y + 1) * W]

        mask = mask_ref[...]                               # (1, Npad) interior mask

        # ---- stage 2: EUCB = depthwise 3x3 (VPU FMAs, BN scale folded) + shift +
        #                      ReLU + 1x1 pointwise (MXU).  channel_shuffle(groups=C)
        #                      is an exact identity -> elided.
        xu = ext_u[...]
        acc = vecC_ref[:, 0:1] * xu[:, G + offs[0]:G + offs[0] + Npad]
        for d in range(1, 9):
            s = G + offs[d]
            acc = acc + vecC_ref[:, d:d + 1] * xu[:, s:s + Npad]
        y1 = jnp.maximum(acc + vecC_ref[:, 9:10], 0.0)
        xdu = (jnp.dot(wpw_ref[...], y1, preferred_element_type=f32)
               + vecC_ref[:, 10:11]) * mask                # (CC, Npad)
        ext_d[...] = zC
        ext_d[:, G:G + Npad] = xdu

        # ---- stage 3: LGAG + residual (one merged [Wg|Wx] matmul, psi on VPU) ----
        xd_e = ext_d[...]
        xs_e = ext_s[...]
        P = jnp.concatenate(
            [xd_e[:, G + o:G + o + Npad] for o in offs] +
            [xs_e[:, G + o:G + o + Npad] for o in offs], axis=0)   # (18*CC, Npad)
        gx = jnp.dot(wgx_ref[...], P, preferred_element_type=f32) + vecF_ref[:, 0:1]
        pre = jnp.maximum(gx, 0.0)                                  # (F8, Npad)
        z = jnp.sum(vecF_ref[:, 1:2] * pre, axis=0, keepdims=True) + vecF_ref[0:1, 2:3]
        attn = jax.nn.sigmoid(z)                                    # (1, Npad)
        out = xd_e[:, G:G + Npad] + xs_e[:, G:G + Npad] * attn      # (CC, Npad)
        ext_o[...] = zC
        ext_o[:, G:G + Npad] = out

        # ---- stage 4: Doubleconv (conv+bias+ReLU+BN, twice; all in VMEM) ----
        xo_e = ext_o[...]
        P1 = jnp.concatenate([xo_e[:, G + o:G + o + Npad] for o in offs], axis=0)
        h1 = jnp.dot(w1_ref[...], P1, preferred_element_type=f32)
        h1 = (jnp.maximum(h1 + vecM_ref[:, 0:1], 0.0) * vecM_ref[:, 1:2]
              + vecM_ref[:, 2:3]) * mask                   # zero border/dead lanes
        ext_h[...] = jnp.zeros((CM, LE), f32)
        ext_h[:, G:G + Npad] = h1
        xh_e = ext_h[...]
        P2 = jnp.concatenate([xh_e[:, G + o:G + o + Npad] for o in offs], axis=0)
        h2 = jnp.dot(w2_ref[...], P2, preferred_element_type=f32)
        o_ref[0] = (jnp.maximum(h2 + vecM_ref[:, 3:4], 0.0) * vecM_ref[:, 4:5]
                    + vecM_ref[:, 5:6])                    # (CM, Npad) lane-dense store

    return kernel


# ---------------------------------------------------------------------------
# Full decoder forward (Pallas path)
# ---------------------------------------------------------------------------
def decoder_forward_pallas(params, x_d, x_skip, cin, cout):
    """x_d: (B, cin, H/2, W/2), x_skip: (B, cin, H, W), both NCHW -> (B, cout, H, W)."""
    f32 = jnp.float32
    B, _, Hd, Wd = x_d.shape
    H, W = 2 * Hd, 2 * Wd
    assert x_skip.shape == (B, cin, H, W)
    g = cin // 2
    fint = cout
    assert fint % g == 0 and cin % g == 0, "grouped convs need divisible channel counts"

    Hp, Wp = H + 2, W + 2
    N = Hp * Wp                         # padded-flattened spatial length
    Npad = -(-N // 128) * 128           # lane-padded to a multiple of 128
    G = Wp + 1                          # flat halo of one 3x3 conv
    offs = [(ky - 1) * Wp + (kx - 1) for ky in range(3) for kx in range(3)]
    CC, CM, F8 = _ceil8(cin), _ceil8(cout), _ceil8(fint)
    LE = Npad + 2 * G

    def pad_rows(a, r):
        return jnp.pad(a, ((0, r - a.shape[0]), (0, 0)))

    # inputs: free NCHW reshape to (B, C, H*W); channel pad is a no-op when C is already
    # a multiple of 8 (all up-/pad-/flatten work happens inside the kernel).
    x_df = jnp.pad(x_d.astype(f32).reshape(B, cin, Hd * Wd),
                   ((0, 0), (0, CC - cin), (0, 0)))
    x_sf = jnp.pad(x_skip.astype(f32).reshape(B, cin, H * W),
                   ((0, 0), (0, CC - cin), (0, 0)))

    # nearest-2x column-duplication matrix (one-hot): row j -> lanes 2j, 2j+1
    U = jnp.kron(jnp.eye(Wd, dtype=f32), jnp.ones((1, 2), f32))          # (Wd, W)

    # interior mask over the padded-flattened, lane-padded domain
    mask = jnp.pad(jnp.pad(jnp.ones((H, W), f32), ((1, 1), (1, 1))).reshape(1, N),
                   ((0, 0), (0, Npad - N)))

    # ---- fold BatchNorm / bias into matmul weights & packed per-channel vectors ----
    # EUCB: vecC = [9 depthwise taps (BN scale folded) | BN shift | pwc bias]
    s_dw, t_dw = _bn_affine(params["dwc_bn"])
    vecC = jnp.zeros((CC, 11), f32)
    vecC = vecC.at[:cin, 0:9].set(params["dwc_w"].reshape(cin, 9) * s_dw[:, None])
    vecC = vecC.at[:cin, 9].set(t_dw)
    vecC = vecC.at[:cin, 10].set(params["pwc_b"])
    w_pw = jnp.pad(params["pwc_w"].reshape(cin, cin), ((0, CC - cin), (0, CC - cin)))

    # LGAG: merged [Wg | Wx] matmul; vecF = [combined shift | psi weights | psi shift]
    s_g, t_g = _bn_affine(params["wg_bn"])
    w_g = _conv_matrix(_grouped_to_dense(params["wg_w"], g), CC) * s_g[:, None]
    s_x, t_x = _bn_affine(params["wx_bn"])
    w_x = _conv_matrix(_grouped_to_dense(params["wx_w"], g), CC) * s_x[:, None]
    w_gx = pad_rows(jnp.concatenate([w_g, w_x], axis=1), F8)            # (F8, 18*CC)
    s_p, t_p = _bn_affine(params["psi_bn"])
    vecF = jnp.zeros((F8, 3), f32)
    vecF = vecF.at[:fint, 0].set(params["wg_b"] * s_g + t_g + params["wx_b"] * s_x + t_x)
    vecF = vecF.at[:fint, 1].set(params["psi_w"].reshape(fint) * s_p[0])
    vecF = vecF.at[:, 2].set(params["psi_b"][0] * s_p[0] + t_p[0])

    # Doubleconv: vecM = [b1 | s1 | t1 | b2 | s2 | t2] (padded rows exactly zero)
    s_1, t_1 = _bn_affine(params["dc1_bn"])
    s_2, t_2 = _bn_affine(params["dc2_bn"])
    w_1 = pad_rows(_conv_matrix(params["dc1_w"], CC), CM)               # (CM, 9*CC)
    w_2 = pad_rows(_conv_matrix(params["dc2_w"], CM), CM)               # (CM, 9*CM)
    vecM = jnp.zeros((CM, 6), f32)
    vecM = vecM.at[:cout, 0].set(params["dc1_b"])
    vecM = vecM.at[:cout, 1].set(s_1)
    vecM = vecM.at[:cout, 2].set(t_1)
    vecM = vecM.at[:cout, 3].set(params["dc2_b"])
    vecM = vecM.at[:cout, 4].set(s_2)
    vecM = vecM.at[:cout, 5].set(t_2)

    def const2(arr):
        return pl.BlockSpec(arr.shape, lambda b: (0, 0))

    out_flat = pl.pallas_call(
        _make_decoder_kernel(CC, CM, Hd, Wd, H, W, Wp, Npad, G, offs),
        out_shape=jax.ShapeDtypeStruct((B, CM, Npad), f32),
        grid=(B,),
        in_specs=[
            pl.BlockSpec((1, CC, Hd * Wd), lambda b: (b, 0, 0)),
            pl.BlockSpec((1, CC, H * W), lambda b: (b, 0, 0)),
            const2(U), const2(vecC), const2(w_pw), const2(w_gx),
            const2(vecF), const2(w_1), const2(vecM), const2(w_2), const2(mask),
        ],
        out_specs=pl.BlockSpec((1, CM, Npad), lambda b: (b, 0, 0)),
        scratch_shapes=[
            pltpu.VMEM((CC, LE), f32),   # ext_u: upsampled + padded x_d
            pltpu.VMEM((CC, LE), f32),   # ext_s: padded x_skip
            pltpu.VMEM((CC, LE), f32),   # ext_d: padded x_d_up (EUCB output)
            pltpu.VMEM((CC, LE), f32),   # ext_o: padded LGAG+residual output
            pltpu.VMEM((CM, LE), f32),   # ext_h: padded conv1 output
        ],
        compiler_params=pltpu.CompilerParams(dimension_semantics=("parallel",)),
    )(x_df, x_sf, U, vecC, w_pw, w_gx, vecF, w_1, vecM, w_2, mask)

    # (B, CM, Npad) -> NCHW (B, cout, H, W)
    return out_flat[:, :cout, :N].reshape(B, cout, Hp, Wp)[:, :, 1:1 + H, 1:1 + W]


# ---------------------------------------------------------------------------
# Pure-JAX reference (for correctness check)
# ---------------------------------------------------------------------------
def decoder_forward_ref(params, x_d_nchw, x_skip_nchw, cin, cout):
    x_d = jnp.transpose(x_d_nchw, (0, 2, 3, 1)).astype(jnp.float32)
    x_skip = jnp.transpose(x_skip_nchw, (0, 2, 3, 1)).astype(jnp.float32)

    def conv(x, w, b, pad, groups):
        w_hwio = jnp.transpose(w, (2, 3, 1, 0))
        y = jax.lax.conv_general_dilated(
            x, w_hwio, (1, 1), [(pad, pad), (pad, pad)],
            dimension_numbers=("NHWC", "HWIO", "NHWC"),
            feature_group_count=groups)
        return y if b is None else y + b

    def bn(x, p):
        return (x - p["mean"]) / jnp.sqrt(p["var"] + EPS) * p["gamma"] + p["beta"]

    x_up = jnp.repeat(jnp.repeat(x_d, 2, axis=1), 2, axis=2)
    y = jnp.maximum(bn(conv(x_up, params["dwc_w"], None, 1, cin), params["dwc_bn"]), 0.0)
    x_d_up = conv(y, params["pwc_w"], params["pwc_b"], 0, 1)

    g = cin // 2
    g1 = bn(conv(x_d_up, params["wg_w"], params["wg_b"], 1, g), params["wg_bn"])
    x1 = bn(conv(x_skip, params["wx_w"], params["wx_b"], 1, g), params["wx_bn"])
    psi = jax.nn.sigmoid(bn(conv(jnp.maximum(g1 + x1, 0.0),
                                 params["psi_w"], params["psi_b"], 0, 1),
                            params["psi_bn"]))
    out = x_d_up + x_skip * psi

    h = bn(jnp.maximum(conv(out, params["dc1_w"], params["dc1_b"], 1, 1), 0.0),
           params["dc1_bn"])
    h = bn(jnp.maximum(conv(h, params["dc2_w"], params["dc2_b"], 1, 1), 0.0),
           params["dc2_bn"])
    return jnp.transpose(h, (0, 3, 1, 2))


# ---------------------------------------------------------------------------
if __name__ == "__main__":
    B, CIN, COUT, H, W = 2, 8, 4, 8, 8
    key = jax.random.PRNGKey(0)
    kx, ks, kp = jax.random.split(key, 3)
    # PyTorch-style NCHW inputs; x_skip is at the upsampled resolution.
    x_d = jax.random.normal(kx, (B, CIN, H, W), jnp.float32)
    x_skip = jax.random.normal(ks, (B, CIN, 2 * H, 2 * W), jnp.float32)
    params = init_params(kp, CIN, COUT)

    fwd = jax.jit(decoder_forward_pallas, static_argnums=(3, 4))
    out = jax.block_until_ready(fwd(params, x_d, x_skip, CIN, COUT))
    assert out.shape == (B, COUT, 2 * H, 2 * W), out.shape

    ref = decoder_forward_ref(params, x_d, x_skip, CIN, COUT)
    # tolerance accounts for default (reduced-precision) MXU passes differing between
    # the Pallas matmul path and the XLA conv path for f32 operands.
    np.testing.assert_allclose(np.asarray(out), np.asarray(ref), rtol=2e-2, atol=1e-2)

    print("KERNEL_OK")
</pallas_src>

<mosaic_0001>
module attributes {stable_mosaic.version = 11 : i64} {
  func.func @kernel(%arg0: i32, %arg1: memref<1x8x64xf32, #tpu.memory_space<vmem>>, %arg2: memref<1x8x256xf32, #tpu.memory_space<vmem>>, %arg3: memref<8x16xf32, #tpu.memory_space<vmem>>, %arg4: memref<8x11xf32, #tpu.memory_space<vmem>>, %arg5: memref<8x8xf32, #tpu.memory_space<vmem>>, %arg6: memref<8x144xf32, #tpu.memory_space<vmem>>, %arg7: memref<8x3xf32, #tpu.memory_space<vmem>>, %arg8: memref<8x72xf32, #tpu.memory_space<vmem>>, %arg9: memref<8x6xf32, #tpu.memory_space<vmem>>, %arg10: memref<8x72xf32, #tpu.memory_space<vmem>>, %arg11: memref<1x384xf32, #tpu.memory_space<vmem>>, %arg12: memref<1x8x384xf32, #tpu.memory_space<vmem>>, %arg13: memref<8x422xf32, #tpu.memory_space<vmem>>, %arg14: memref<8x422xf32, #tpu.memory_space<vmem>>, %arg15: memref<8x422xf32, #tpu.memory_space<vmem>>, %arg16: memref<8x422xf32, #tpu.memory_space<vmem>>, %arg17: memref<8x422xf32, #tpu.memory_space<vmem>>) attributes {dimension_semantics = [#tpu.dimension_semantics<parallel>], iteration_bounds = array<i64: 2>, scalar_prefetch = 0 : i64, scratch_operands = 5 : i64, tpu.core_type = #tpu.core_type<tc>, window_params = [{transform_indices = @transform_0, window_bounds = array<i64: 1, 8, 64>}, {transform_indices = @transform_1, window_bounds = array<i64: 1, 8, 256>}, {pipeline_mode = #tpu.pipeline_mode<synchronous>, transform_indices = @transform_2, window_bounds = array<i64: 8, 16>}, {pipeline_mode = #tpu.pipeline_mode<synchronous>, transform_indices = @transform_3, window_bounds = array<i64: 8, 11>}, {pipeline_mode = #tpu.pipeline_mode<synchronous>, transform_indices = @transform_4, window_bounds = array<i64: 8, 8>}, {pipeline_mode = #tpu.pipeline_mode<synchronous>, transform_indices = @transform_5, window_bounds = array<i64: 8, 144>}, {pipeline_mode = #tpu.pipeline_mode<synchronous>, transform_indices = @transform_6, window_bounds = array<i64: 8, 3>}, {pipeline_mode = #tpu.pipeline_mode<synchronous>, transform_indices = @transform_7, window_bounds = array<i64: 8, 72>}, {pipeline_mode = #tpu.pipeline_mode<synchronous>, transform_indices = @transform_8, window_bounds = array<i64: 8, 6>}, {pipeline_mode = #tpu.pipeline_mode<synchronous>, transform_indices = @transform_9, window_bounds = array<i64: 8, 72>}, {pipeline_mode = #tpu.pipeline_mode<synchronous>, transform_indices = @transform_10, window_bounds = array<i64: 1, 384>}, {transform_indices = @transform_11, window_bounds = array<i64: 1, 8, 384>}]} {
    %cst = arith.constant 0.000000e+00 : f32
    %0 = vector.broadcast %cst : f32 to vector<8x422xf32>
    %c0 = arith.constant 0 : index
    %c0_0 = arith.constant 0 : index
    %1 = vector.load %arg13[%c0, %c0_0] : memref<8x422xf32, #tpu.memory_space<vmem>>, vector<8x422xf32>
    tpu.vector_store %arg13[%c0, %c0_0], %0 {strides = array<i32>} : memref<8x422xf32, #tpu.memory_space<vmem>>, vector<8x422xf32>,
    %c0_1 = arith.constant 0 : index
    %c0_2 = arith.constant 0 : index
    %c0_3 = arith.constant 0 : index
    %2 = vector.load %arg1[%c0_1, %c0_2, %c0_3] : memref<1x8x64xf32, #tpu.memory_space<vmem>>, vector<1x8x64xf32>
    %3 = vector.shape_cast %2 : vector<1x8x64xf32> to vector<8x64xf32>
    %c0_4 = arith.constant 0 : index
    %c0_5 = arith.constant 0 : index
    %4 = vector.load %arg3[%c0_4, %c0_5] : memref<8x16xf32, #tpu.memory_space<vmem>>, vector<8x16xf32>
    %5 = vector.extract_strided_slice %3 {offsets = [0, 0], sizes = [8, 8], strides = [1, 1]} : vector<8x64xf32> to vector<8x8xf32>
    %cst_6 = arith.constant dense<0.000000e+00> : vector<8x16xf32>
    %6 = tpu.matmul %5, %4, %cst_6 {dimension_numbers = #tpu.dot_dimension_numbers<[1], [0], [0], [1], [0, 0, 1, 1], [], []>} : vector<8x8xf32>, vector<8x16xf32>, vector<8x16xf32> -> vector<8x16xf32>
    %c0_7 = arith.constant 0 : index
    %c38 = arith.constant 38 : index
    %7 = vector.load %arg13[%c0_7, %c38] : memref<8x422xf32, #tpu.memory_space<vmem>>, vector<8x16xf32>
    tpu.vector_store %arg13[%c0_7, %c38], %6 {strides = array<i32>} : memref<8x422xf32, #tpu.memory_space<vmem>>, vector<8x16xf32>,
    %c0_8 = arith.constant 0 : index
    %c56 = arith.constant 56 : index
    %8 = vector.load %arg13[%c0_8, %c56] : memref<8x422xf32, #tpu.memory_space<vmem>>, vector<8x16xf32>
    tpu.vector_store %arg13[%c0_8, %c56], %6 {strides = array<i32>} : memref<8x422xf32, #tpu.memory_space<vmem>>, vector<8x16xf32>,
    %9 = vector.extract_strided_slice %3 {offsets = [0, 8], sizes = [8, 8], strides = [1, 1]} : vector<8x64xf32> to vector<8x8xf32>
    %cst_9 = arith.constant dense<0.000000e+00> : vector<8x16xf32>
    %10 = tpu.matmul %9, %4, %cst_9 {dimension_numbers = #tpu.dot_dimension_numbers<[1], [0], [0], [1], [0, 0, 1, 1], [], []>} : vector<8x8xf32>, vector<8x16xf32>, vector<8x16xf32> -> vector<8x16xf32>
    %c0_10 = arith.constant 0 : index
    %c74 = arith.constant 74 : index
    %11 = vector.load %arg13[%c0_10, %c74] : memref<8x422xf32, #tpu.memory_space<vmem>>, vector<8x16xf32>
    tpu.vector_store %arg13[%c0_10, %c74], %10 {strides = array<i32>} : memref<8x422xf32, #tpu.memory_space<vmem>>, vector<8x16xf32>,
    %c0_11 = arith.constant 0 : index
    %c92 = arith.constant 92 : index
    %12 = vector.load %arg13[%c0_11, %c92] : memref<8x422xf32, #tpu.memory_space<vmem>>, vector<8x16xf32>
    tpu.vector_store %arg13[%c0_11, %c92], %10 {strides = array<i32>} : memref<8x422xf32, #tpu.memory_space<vmem>>, vector<8x16xf32>,
    %13 = vector.extract_strided_slice %3 {offsets = [0, 16], sizes = [8, 8], strides = [1, 1]} : vector<8x64xf32> to vector<8x8xf32>
    %cst_12 = arith.constant dense<0.000000e+00> : vector<8x16xf32>
    %14 = tpu.matmul %13, %4, %cst_12 {dimension_numbers = #tpu.dot_dimension_numbers<[1], [0], [0], [1], [0, 0, 1, 1], [], []>} : vector<8x8xf32>, vector<8x16xf32>, vector<8x16xf32> -> vector<8x16xf32>
    %c0_13 = arith.constant 0 : index
    %c110 = arith.constant 110 : index
    %15 = vector.load %arg13[%c0_13, %c110] : memref<8x422xf32, #tpu.memory_space<vmem>>, vector<8x16xf32>
    tpu.vector_store %arg13[%c0_13, %c110], %14 {strides = array<i32>} : memref<8x422xf32, #tpu.memory_space<vmem>>, vector<8x16xf32>,
    %c0_14 = arith.constant 0 : index
    %c128 = arith.constant 128 : index
    %16 = vector.load %arg13[%c0_14, %c128] : memref<8x422xf32, #tpu.memory_space<vmem>>, vector<8x16xf32>
    tpu.vector_store %arg13[%c0_14, %c128], %14 {strides = array<i32>} : memref<8x422xf32, #tpu.memory_space<vmem>>, vector<8x16xf32>,
    %17 = vector.extract_strided_slice %3 {offsets = [0, 24], sizes = [8, 8], strides = [1, 1]} : vector<8x64xf32> to vector<8x8xf32>
    %cst_15 = arith.constant dense<0.000000e+00> : vector<8x16xf32>
    %18 = tpu.matmul %17, %4, %cst_15 {dimension_numbers = #tpu.dot_dimension_numbers<[1], [0], [0], [1], [0, 0, 1, 1], [], []>} : vector<8x8xf32>, vector<8x16xf32>, vector<8x16xf32> -> vector<8x16xf32>
    %c0_16 = arith.constant 0 : index
    %c146 = arith.constant 146 : index
    %19 = vector.load %arg13[%c0_16, %c146] : memref<8x422xf32, #tpu.memory_space<vmem>>, vector<8x16xf32>
    tpu.vector_store %arg13[%c0_16, %c146], %18 {strides = array<i32>} : memref<8x422xf32, #tpu.memory_space<vmem>>, vector<8x16xf32>,
    %c0_17 = arith.constant 0 : index
    %c164 = arith.constant 164 : index
    %20 = vector.load %arg13[%c0_17, %c164] : memref<8x422xf32, #tpu.memory_space<vmem>>, vector<8x16xf32>
    tpu.vector_store %arg13[%c0_17, %c164], %18 {strides = array<i32>} : memref<8x422xf32, #tpu.memory_space<vmem>>, vector<8x16xf32>,
    %21 = vector.extract_strided_slice %3 {offsets = [0, 32], sizes = [8, 8], strides = [1, 1]} : vector<8x64xf32> to vector<8x8xf32>
    %cst_18 = arith.constant dense<0.000000e+00> : vector<8x16xf32>
    %22 = tpu.matmul %21, %4, %cst_18 {dimension_numbers = #tpu.dot_dimension_numbers<[1], [0], [0], [1], [0, 0, 1, 1], [], []>} : vector<8x8xf32>, vector<8x16xf32>, vector<8x16xf32> -> vector<8x16xf32>
    %c0_19 = arith.constant 0 : index
    %c182 = arith.constant 182 : index
    %23 = vector.load %arg13[%c0_19, %c182] : memref<8x422xf32, #tpu.memory_space<vmem>>, vector<8x16xf32>
    tpu.vector_store %arg13[%c0_19, %c182], %22 {strides = array<i32>} : memref<8x422xf32, #tpu.memory_space<vmem>>, vector<8x16xf32>,
    %c0_20 = arith.constant 0 : index
    %c200 = arith.constant 200 : index
    %24 = vector.load %arg13[%c0_20, %c200] : memref<8x422xf32, #tpu.memory_space<vmem>>, vector<8x16xf32>
    tpu.vector_store %arg13[%c0_20, %c200], %22 {strides = array<i32>} : memref<8x422xf32, #tpu.memory_space<vmem>>, vector<8x16xf32>,
    %25 = vector.extract_strided_slice %3 {offsets = [0, 40], sizes = [8, 8], strides = [1, 1]} : vector<8x64xf32> to vector<8x8xf32>
    %cst_21 = arith.constant dense<0.000000e+00> : vector<8x16xf32>
    %26 = tpu.matmul %25, %4, %cst_21 {dimension_numbers = #tpu.dot_dimension_numbers<[1], [0], [0], [1], [0, 0, 1, 1], [], []>} : vector<8x8xf32>, vector<8x16xf32>, vector<8x16xf32> -> vector<8x16xf32>
    %c0_22 = arith.constant 0 : index
    %c218 = arith.constant 218 : index
    %27 = vector.load %arg13[%c0_22, %c218] : memref<8x422xf32, #tpu.memory_space<vmem>>, vector<8x16xf32>
    tpu.vector_store %arg13[%c0_22, %c218], %26 {strides = array<i32>} : memref<8x422xf32, #tpu.memory_space<vmem>>, vector<8x16xf32>,
    %c0_23 = arith.constant 0 : index
    %c236 = arith.constant 236 : index
    %28 = vector.load %arg13[%c0_23, %c236] : memref<8x422xf32, #tpu.memory_space<vmem>>, vector<8x16xf32>
    tpu.vector_store %arg13[%c0_23, %c236], %26 {strides = array<i32>} : memref<8x422xf32, #tpu.memory_space<vmem>>, vector<8x16xf32>,
    %29 = vector.extract_strided_slice %3 {offsets = [0, 48], sizes = [8, 8], strides = [1, 1]} : vector<8x64xf32> to vector<8x8xf32>
    %cst_24 = arith.constant dense<0.000000e+00> : vector<8x16xf32>
    %30 = tpu.matmul %29, %4, %cst_24 {dimension_numbers = #tpu.dot_dimension_numbers<[1], [0], [0], [1], [0, 0, 1, 1], [], []>} : vector<8x8xf32>, vector<8x16xf32>, vector<8x16xf32> -> vector<8x16xf32>
    %c0_25 = arith.constant 0 : index
    %c254 = arith.constant 254 : index
    %31 = vector.load %arg13[%c0_25, %c254] : memref<8x422xf32, #tpu.memory_space<vmem>>, vector<8x16xf32>
    tpu.vector_store %arg13[%c0_25, %c254], %30 {strides = array<i32>} : memref<8x422xf32, #tpu.memory_space<vmem>>, vector<8x16xf32>,
    %c0_26 = arith.constant 0 : index
    %c272 = arith.constant 272 : index
    %32 = vector.load %arg13[%c0_26, %c272] : memref<8x422xf32, #tpu.memory_space<vmem>>, vector<8x16xf32>
    tpu.vector_store %arg13[%c0_26, %c272], %30 {strides = array<i32>} : memref<8x422xf32, #tpu.memory_space<vmem>>, vector<8x16xf32>,
    %33 = vector.extract_strided_slice %3 {offsets = [0, 56], sizes = [8, 8], strides = [1, 1]} : vector<8x64xf32> to vector<8x8xf32>
    %cst_27 = arith.constant dense<0.000000e+00> : vector<8x16xf32>
    %34 = tpu.matmul %33, %4, %cst_27 {dimension_numbers = #tpu.dot_dimension_numbers<[1], [0], [0], [1], [0, 0, 1, 1], [], []>} : vector<8x8xf32>, vector<8x16xf32>, vector<8x16xf32> -> vector<8x16xf32>
    %c0_28 = arith.constant 0 : index
    %c290 = arith.constant 290 : index
    %35 = vector.load %arg13[%c0_28, %c290] : memref<8x422xf32, #tpu.memory_space<vmem>>, vector<8x16xf32>
    tpu.vector_store %arg13[%c0_28, %c290], %34 {strides = array<i32>} : memref<8x422xf32, #tpu.memory_space<vmem>>, vector<8x16xf32>,
    %c0_29 = arith.constant 0 : index
    %c308 = arith.constant 308 : index
    %36 = vector.load %arg13[%c0_29, %c308] : memref<8x422xf32, #tpu.memory_space<vmem>>, vector<8x16xf32>
    tpu.vector_store %arg13[%c0_29, %c308], %34 {strides = array<i32>} : memref<8x422xf32, #tpu.memory_space<vmem>>, vector<8x16xf32>,
    %c0_30 = arith.constant 0 : index
    %c0_31 = arith.constant 0 : index
    %37 = vector.load %arg14[%c0_30, %c0_31] : memref<8x422xf32, #tpu.memory_space<vmem>>, vector<8x422xf32>
    tpu.vector_store %arg14[%c0_30, %c0_31], %0 {strides = array<i32>} : memref<8x422xf32, #tpu.memory_space<vmem>>, vector<8x422xf32>,
    %c0_32 = arith.constant 0 : index
    %c0_33 = arith.constant 0 : index
    %c0_34 = arith.constant 0 : index
    %38 = vector.load %arg2[%c0_32, %c0_33, %c0_34] : memref<1x8x256xf32, #tpu.memory_space<vmem>>, vector<1x8x256xf32>
    %39 = vector.shape_cast %38 : vector<1x8x256xf32> to vector<8x256xf32>
    %40 = vector.extract_strided_slice %39 {offsets = [0, 0], sizes = [8, 16], strides = [1, 1]} : vector<8x256xf32> to vector<8x16xf32>
    %c0_35 = arith.constant 0 : index
    %c38_36 = arith.constant 38 : index
    %41 = vector.load %arg14[%c0_35, %c38_36] : memref<8x422xf32, #tpu.memory_space<vmem>>, vector<8x16xf32>
    tpu.vector_store %arg14[%c0_35, %c38_36], %40 {strides = array<i32>} : memref<8x422xf32, #tpu.memory_space<vmem>>, vector<8x16xf32>,
    %42 = vector.extract_strided_slice %39 {offsets = [0, 16], sizes = [8, 16], strides = [1, 1]} : vector<8x256xf32> to vector<8x16xf32>
    %c0_37 = arith.constant 0 : index
    %c56_38 = arith.constant 56 : index
    %43 = vector.load %arg14[%c0_37, %c56_38] : memref<8x422xf32, #tpu.memory_space<vmem>>, vector<8x16xf32>
    tpu.vector_store %arg14[%c0_37, %c56_38], %42 {strides = array<i32>} : memref<8x422xf32, #tpu.memory_space<vmem>>, vector<8x16xf32>,
    %44 = vector.extract_strided_slice %39 {offsets = [0, 32], sizes = [8, 16], strides = [1, 1]} : vector<8x256xf32> to vector<8x16xf32>
    %c0_39 = arith.constant 0 : index
    %c74_40 = arith.constant 74 : index
    %45 = vector.load %arg14[%c0_39, %c74_40] : memref<8x422xf32, #tpu.memory_space<vmem>>, vector<8x16xf32>
    tpu.vector_store %arg14[%c0_39, %c74_40], %44 {strides = array<i32>} : memref<8x422xf32, #tpu.memory_space<vmem>>, vector<8x16xf32>,
    %46 = vector.extract_strided_slice %39 {offsets = [0, 48], sizes = [8, 16], strides = [1, 1]} : vector<8x256xf32> to vector<8x16xf32>
    %c0_41 = arith.constant 0 : index
    %c92_42 = arith.constant 92 : index
    %47 = vector.load %arg14[%c0_41, %c92_42] : memref<8x422xf32, #tpu.memory_space<vmem>>, vector<8x16xf32>
    tpu.vector_store %arg14[%c0_41, %c92_42], %46 {strides = array<i32>} : memref<8x422xf32, #tpu.memory_space<vmem>>, vector<8x16xf32>,
    %48 = vector.extract_strided_slice %39 {offsets = [0, 64], sizes = [8, 16], strides = [1, 1]} : vector<8x256xf32> to vector<8x16xf32>
    %c0_43 = arith.constant 0 : index
    %c110_44 = arith.constant 110 : index
    %49 = vector.load %arg14[%c0_43, %c110_44] : memref<8x422xf32, #tpu.memory_space<vmem>>, vector<8x16xf32>
    tpu.vector_store %arg14[%c0_43, %c110_44], %48 {strides = array<i32>} : memref<8x422xf32, #tpu.memory_space<vmem>>, vector<8x16xf32>,
    %50 = vector.extract_strided_slice %39 {offsets = [0, 80], sizes = [8, 16], strides = [1, 1]} : vector<8x256xf32> to vector<8x16xf32>
    %c0_45 = arith.constant 0 : index
    %c128_46 = arith.constant 128 : index
    %51 = vector.load %arg14[%c0_45, %c128_46] : memref<8x422xf32, #tpu.memory_space<vmem>>, vector<8x16xf32>
    tpu.vector_store %arg14[%c0_45, %c128_46], %50 {strides = array<i32>} : memref<8x422xf32, #tpu.memory_space<vmem>>, vector<8x16xf32>,
    %52 = vector.extract_strided_slice %39 {offsets = [0, 96], sizes = [8, 16], strides = [1, 1]} : vector<8x256xf32> to vector<8x16xf32>
    %c0_47 = arith.constant 0 : index
    %c146_48 = arith.constant 146 : index
    %53 = vector.load %arg14[%c0_47, %c146_48] : memref<8x422xf32, #tpu.memory_space<vmem>>, vector<8x16xf32>
    tpu.vector_store %arg14[%c0_47, %c146_48], %52 {strides = array<i32>} : memref<8x422xf32, #tpu.memory_space<vmem>>, vector<8x16xf32>,
    %54 = vector.extract_strided_slice %39 {offsets = [0, 112], sizes = [8, 16], strides = [1, 1]} : vector<8x256xf32> to vector<8x16xf32>
    %c0_49 = arith.constant 0 : index
    %c164_50 = arith.constant 164 : index
    %55 = vector.load %arg14[%c0_49, %c164_50] : memref<8x422xf32, #tpu.memory_space<vmem>>, vector<8x16xf32>
    tpu.vector_store %arg14[%c0_49, %c164_50], %54 {strides = array<i32>} : memref<8x422xf32, #tpu.memory_space<vmem>>, vector<8x16xf32>,
    %56 = vector.extract_strided_slice %39 {offsets = [0, 128], sizes = [8, 16], strides = [1, 1]} : vector<8x256xf32> to vector<8x16xf32>
    %c0_51 = arith.constant 0 : index
    %c182_52 = arith.constant 182 : index
    %57 = vector.load %arg14[%c0_51, %c182_52] : memref<8x422xf32, #tpu.memory_space<vmem>>, vector<8x16xf32>
    tpu.vector_store %arg14[%c0_51, %c182_52], %56 {strides = array<i32>} : memref<8x422xf32, #tpu.memory_space<vmem>>, vector<8x16xf32>,
    %58 = vector.extract_strided_slice %39 {offsets = [0, 144], sizes = [8, 16], strides = [1, 1]} : vector<8x256xf32> to vector<8x16xf32>
    %c0_53 = arith.constant 0 : index
    %c200_54 = arith.constant 200 : index
    %59 = vector.load %arg14[%c0_53, %c200_54] : memref<8x422xf32, #tpu.memory_space<vmem>>, vector<8x16xf32>
    tpu.vector_store %arg14[%c0_53, %c200_54], %58 {strides = array<i32>} : memref<8x422xf32, #tpu.memory_space<vmem>>, vector<8x16xf32>,
    %60 = vector.extract_strided_slice %39 {offsets = [0, 160], sizes = [8, 16], strides = [1, 1]} : vector<8x256xf32> to vector<8x16xf32>
    %c0_55 = arith.constant 0 : index
    %c218_56 = arith.constant 218 : index
    %61 = vector.load %arg14[%c0_55, %c218_56] : memref<8x422xf32, #tpu.memory_space<vmem>>, vector<8x16xf32>
    tpu.vector_store %arg14[%c0_55, %c218_56], %60 {strides = array<i32>} : memref<8x422xf32, #tpu.memory_space<vmem>>, vector<8x16xf32>,
    %62 = vector.extract_strided_slice %39 {offsets = [0, 176], sizes = [8, 16], strides = [1, 1]} : vector<8x256xf32> to vector<8x16xf32>
    %c0_57 = arith.constant 0 : index
    %c236_58 = arith.constant 236 : index
    %63 = vector.load %arg14[%c0_57, %c236_58] : memref<8x422xf32, #tpu.memory_space<vmem>>, vector<8x16xf32>
    tpu.vector_store %arg14[%c0_57, %c236_58], %62 {strides = array<i32>} : memref<8x422xf32, #tpu.memory_space<vmem>>, vector<8x16xf32>,
    %64 = vector.extract_strided_slice %39 {offsets = [0, 192], sizes = [8, 16], strides = [1, 1]} : vector<8x256xf32> to vector<8x16xf32>
    %c0_59 = arith.constant 0 : index
    %c254_60 = arith.constant 254 : index
    %65 = vector.load %arg14[%c0_59, %c254_60] : memref<8x422xf32, #tpu.memory_space<vmem>>, vector<8x16xf32>
    tpu.vector_store %arg14[%c0_59, %c254_60], %64 {strides = array<i32>} : memref<8x422xf32, #tpu.memory_space<vmem>>, vector<8x16xf32>,
    %66 = vector.extract_strided_slice %39 {offsets = [0, 208], sizes = [8, 16], strides = [1, 1]} : vector<8x256xf32> to vector<8x16xf32>
    %c0_61 = arith.constant 0 : index
    %c272_62 = arith.constant 272 : index
    %67 = vector.load %arg14[%c0_61, %c272_62] : memref<8x422xf32, #tpu.memory_space<vmem>>, vector<8x16xf32>
    tpu.vector_store %arg14[%c0_61, %c272_62], %66 {strides = array<i32>} : memref<8x422xf32, #tpu.memory_space<vmem>>, vector<8x16xf32>,
    %68 = vector.extract_strided_slice %39 {offsets = [0, 224], sizes = [8, 16], strides = [1, 1]} : vector<8x256xf32> to vector<8x16xf32>
    %c0_63 = arith.constant 0 : index
    %c290_64 = arith.constant 290 : index
    %69 = vector.load %arg14[%c0_63, %c290_64] : memref<8x422xf32, #tpu.memory_space<vmem>>, vector<8x16xf32>
    tpu.vector_store %arg14[%c0_63, %c290_64], %68 {strides = array<i32>} : memref<8x422xf32, #tpu.memory_space<vmem>>, vector<8x16xf32>,
    %70 = vector.extract_strided_slice %39 {offsets = [0, 240], sizes = [8, 16], strides = [1, 1]} : vector<8x256xf32> to vector<8x16xf32>
    %c0_65 = arith.constant 0 : index
    %c308_66 = arith.constant 308 : index
    %71 = vector.load %arg14[%c0_65, %c308_66] : memref<8x422xf32, #tpu.memory_space<vmem>>, vector<8x16xf32>
    tpu.vector_store %arg14[%c0_65, %c308_66], %70 {strides = array<i32>} : memref<8x422xf32, #tpu.memory_space<vmem>>, vector<8x16xf32>,
    %c0_67 = arith.constant 0 : index
    %c0_68 = arith.constant 0 : index
    %72 = vector.load %arg11[%c0_67, %c0_68] : memref<1x384xf32, #tpu.memory_space<vmem>>, vector<1x384xf32>
    %c0_69 = arith.constant 0 : index
    %c0_70 = arith.constant 0 : index
    %73 = vector.load %arg13[%c0_69, %c0_70] : memref<8x422xf32, #tpu.memory_space<vmem>>, vector<8x422xf32>
    %c0_71 = arith.constant 0 : index
    %c0_72 = arith.constant 0 : index
    %74 = vector.load %arg4[%c0_71, %c0_72] : memref<8x11xf32, #tpu.memory_space<vmem>>, vector<8x1xf32>
    %75 = vector.extract_strided_slice %73 {offsets = [0, 0], sizes = [8, 384], strides = [1, 1]} : vector<8x422xf32> to vector<8x384xf32>
    %76 = vector.broadcast %74 : vector<8x1xf32> to vector<8x384xf32>
    %77 = arith.mulf %76, %75 : vector<8x384xf32>
    %c0_73 = arith.constant 0 : index
    %c1 = arith.constant 1 : index
    %78 = vector.load %arg4[%c0_73, %c1] : memref<8x11xf32, #tpu.memory_space<vmem>>, vector<8x1xf32>
    %79 = vector.extract_strided_slice %73 {offsets = [0, 1], sizes = [8, 384], strides = [1, 1]} : vector<8x422xf32> to vector<8x384xf32>
    %80 = vector.broadcast %78 : vector<8x1xf32> to vector<8x384xf32>
    %81 = arith.mulf %80, %79 : vector<8x384xf32>
    %82 = arith.addf %77, %81 : vector<8x384xf32>
    %c0_74 = arith.constant 0 : index
    %c2 = arith.constant 2 : index
    %83 = vector.load %arg4[%c0_74, %c2] : memref<8x11xf32, #tpu.memory_space<vmem>>, vector<8x1xf32>
    %84 = vector.extract_strided_slice %73 {offsets = [0, 2], sizes = [8, 384], strides = [1, 1]} : vector<8x422xf32> to vector<8x384xf32>
    %85 = vector.broadcast %83 : vector<8x1xf32> to vector<8x384xf32>
    %86 = arith.mulf %85, %84 : vector<8x384xf32>
    %87 = arith.addf %82, %86 : vector<8x384xf32>
    %c0_75 = arith.constant 0 : index
    %c3 = arith.constant 3 : index
    %88 = vector.load %arg4[%c0_75, %c3] : memref<8x11xf32, #tpu.memory_space<vmem>>, vector<8x1xf32>
    %89 = vector.extract_strided_slice %73 {offsets = [0, 18], sizes = [8, 384], strides = [1, 1]} : vector<8x422xf32> to vector<8x384xf32>
    %90 = vector.broadcast %88 : vector<8x1xf32> to vector<8x384xf32>
    %91 = arith.mulf %90, %89 : vector<8x384xf32>
    %92 = arith.addf %87, %91 : vector<8x384xf32>
    %c0_76 = arith.constant 0 : index
    %c4 = arith.constant 4 : index
    %93 = vector.load %arg4[%c0_76, %c4] : memref<8x11xf32, #tpu.memory_space<vmem>>, vector<8x1xf32>
    %94 = vector.extract_strided_slice %73 {offsets = [0, 19], sizes = [8, 384], strides = [1, 1]} : vector<8x422xf32> to vector<8x384xf32>
    %95 = vector.broadcast %93 : vector<8x1xf32> to vector<8x384xf32>
    %96 = arith.mulf %95, %94 : vector<8x384xf32>
    %97 = arith.addf %92, %96 : vector<8x384xf32>
    %c0_77 = arith.constant 0 : index
    %c5 = arith.constant 5 : index
    %98 = vector.load %arg4[%c0_77, %c5] : memref<8x11xf32, #tpu.memory_space<vmem>>, vector<8x1xf32>
    %99 = vector.extract_strided_slice %73 {offsets = [0, 20], sizes = [8, 384], strides = [1, 1]} : vector<8x422xf32> to vector<8x384xf32>
    %100 = vector.broadcast %98 : vector<8x1xf32> to vector<8x384xf32>
    %101 = arith.mulf %100, %99 : vector<8x384xf32>
    %102 = arith.addf %97, %101 : vector<8x384xf32>
    %c0_78 = arith.constant 0 : index
    %c6 = arith.constant 6 : index
    %103 = vector.load %arg4[%c0_78, %c6] : memref<8x11xf32, #tpu.memory_space<vmem>>, vector<8x1xf32>
    %104 = vector.extract_strided_slice %73 {offsets = [0, 36], sizes = [8, 384], strides = [1, 1]} : vector<8x422xf32> to vector<8x384xf32>
    %105 = vector.broadcast %103 : vector<8x1xf32> to vector<8x384xf32>
    %106 = arith.mulf %105, %104 : vector<8x384xf32>
    %107 = arith.addf %102, %106 : vector<8x384xf32>
    %c0_79 = arith.constant 0 : index
    %c7 = arith.constant 7 : index
    %108 = vector.load %arg4[%c0_79, %c7] : memref<8x11xf32, #tpu.memory_space<vmem>>, vector<8x1xf32>
    %109 = vector.extract_strided_slice %73 {offsets = [0, 37], sizes = [8, 384], strides = [1, 1]} : vector<8x422xf32> to vector<8x384xf32>
    %110 = vector.broadcast %108 : vector<8x1xf32> to vector<8x384xf32>
    %111 = arith.mulf %110, %109 : vector<8x384xf32>
    %112 = arith.addf %107, %111 : vector<8x384xf32>
    %c0_80 = arith.constant 0 : index
    %c8 = arith.constant 8 : index
    %113 = vector.load %arg4[%c0_80, %c8] : memref<8x11xf32, #tpu.memory_space<vmem>>, vector<8x1xf32>
    %114 = vector.extract_strided_slice %73 {offsets = [0, 38], sizes = [8, 384], strides = [1, 1]} : vector<8x422xf32> to vector<8x384xf32>
    %115 = vector.broadcast %113 : vector<8x1xf32> to vector<8x384xf32>
    %116 = arith.mulf %115, %114 : vector<8x384xf32>
    %117 = arith.addf %112, %116 : vector<8x384xf32>
    %c0_81 = arith.constant 0 : index
    %c9 = arith.constant 9 : index
    %118 = vector.load %arg4[%c0_81, %c9] : memref<8x11xf32, #tpu.memory_space<vmem>>, vector<8x1xf32>
    %119 = vector.broadcast %118 : vector<8x1xf32> to vector<8x384xf32>
    %120 = arith.addf %117, %119 : vector<8x384xf32>
    %cst_82 = arith.constant 0.000000e+00 : f32
    %121 = vector.broadcast %cst_82 : f32 to vector<8x384xf32>
    %122 = arith.maximumf %120, %121 : vector<8x384xf32>
    %c0_83 = arith.constant 0 : index
    %c0_84 = arith.constant 0 : index
    %123 = vector.load %arg5[%c0_83, %c0_84] : memref<8x8xf32, #tpu.memory_space<vmem>>, vector<8x8xf32>
    %cst_85 = arith.constant dense<0.000000e+00> : vector<8x384xf32>
    %124 = tpu.matmul %123, %122, %cst_85 {dimension_numbers = #tpu.dot_dimension_numbers<[1], [0], [0], [1], [0, 0, 1, 1], [], []>} : vector<8x8xf32>, vector<8x384xf32>, vector<8x384xf32> -> vector<8x384xf32>
    %c0_86 = arith.constant 0 : index
    %c10 = arith.constant 10 : index
    %125 = vector.load %arg4[%c0_86, %c10] : memref<8x11xf32, #tpu.memory_space<vmem>>, vector<8x1xf32>
    %126 = vector.broadcast %125 : vector<8x1xf32> to vector<8x384xf32>
    %127 = arith.addf %124, %126 : vector<8x384xf32>
    %128 = vector.broadcast %72 : vector<1x384xf32> to vector<8x384xf32>
    %129 = arith.mulf %127, %128 : vector<8x384xf32>
    %c0_87 = arith.constant 0 : index
    %c0_88 = arith.constant 0 : index
    %130 = vector.load %arg15[%c0_87, %c0_88] : memref<8x422xf32, #tpu.memory_space<vmem>>, vector<8x422xf32>
    tpu.vector_store %arg15[%c0_87, %c0_88], %0 {strides = array<i32>} : memref<8x422xf32, #tpu.memory_space<vmem>>, vector<8x422xf32>,
    %c0_89 = arith.constant 0 : index
    %c19 = arith.constant 19 : index
    %131 = vector.load %arg15[%c0_89, %c19] : memref<8x422xf32, #tpu.memory_space<vmem>>, vector<8x384xf32>
    tpu.vector_store %arg15[%c0_89, %c19], %129 {strides = array<i32>} : memref<8x422xf32, #tpu.memory_space<vmem>>, vector<8x384xf32>,
    %c0_90 = arith.constant 0 : index
    %c0_91 = arith.constant 0 : index
    %132 = vector.load %arg15[%c0_90, %c0_91] : memref<8x422xf32, #tpu.memory_space<vmem>>, vector<8x422xf32>
    %c0_92 = arith.constant 0 : index
    %c0_93 = arith.constant 0 : index
    %133 = vector.load %arg14[%c0_92, %c0_93] : memref<8x422xf32, #tpu.memory_space<vmem>>, vector<8x422xf32>
    %134 = vector.extract_strided_slice %132 {offsets = [0, 0], sizes = [8, 384], strides = [1, 1]} : vector<8x422xf32> to vector<8x384xf32>
    %135 = vector.extract_strided_slice %132 {offsets = [0, 1], sizes = [8, 384], strides = [1, 1]} : vector<8x422xf32> to vector<8x384xf32>
    %136 = vector.extract_strided_slice %132 {offsets = [0, 2], sizes = [8, 384], strides = [1, 1]} : vector<8x422xf32> to vector<8x384xf32>
    %137 = vector.extract_strided_slice %132 {offsets = [0, 18], sizes = [8, 384], strides = [1, 1]} : vector<8x422xf32> to vector<8x384xf32>
    %138 = vector.extract_strided_slice %132 {offsets = [0, 19], sizes = [8, 384], strides = [1, 1]} : vector<8x422xf32> to vector<8x384xf32>
    %139 = vector.extract_strided_slice %132 {offsets = [0, 20], sizes = [8, 384], strides = [1, 1]} : vector<8x422xf32> to vector<8x384xf32>
    %140 = vector.extract_strided_slice %132 {offsets = [0, 36], sizes = [8, 384], strides = [1, 1]} : vector<8x422xf32> to vector<8x384xf32>
    %141 = vector.extract_strided_slice %132 {offsets = [0, 37], sizes = [8, 384], strides = [1, 1]} : vector<8x422xf32> to vector<8x384xf32>
    %142 = vector.extract_strided_slice %132 {offsets = [0, 38], sizes = [8, 384], strides = [1, 1]} : vector<8x422xf32> to vector<8x384xf32>
    %143 = vector.extract_strided_slice %133 {offsets = [0, 0], sizes = [8, 384], strides = [1, 1]} : vector<8x422xf32> to vector<8x384xf32>
    %144 = vector.extract_strided_slice %133 {offsets = [0, 1], sizes = [8, 384], strides = [1, 1]} : vector<8x422xf32> to vector<8x384xf32>
    %145 = vector.extract_strided_slice %133 {offsets = [0, 2], sizes = [8, 384], strides = [1, 1]} : vector<8x422xf32> to vector<8x384xf32>
    %146 = vector.extract_strided_slice %133 {offsets = [0, 18], sizes = [8, 384], strides = [1, 1]} : vector<8x422xf32> to vector<8x384xf32>
    %147 = vector.extract_strided_slice %133 {offsets = [0, 19], sizes = [8, 384], strides = [1, 1]} : vector<8x422xf32> to vector<8x384xf32>
    %148 = vector.extract_strided_slice %133 {offsets = [0, 20], sizes = [8, 384], strides = [1, 1]} : vector<8x422xf32> to vector<8x384xf32>
    %149 = vector.extract_strided_slice %133 {offsets = [0, 36], sizes = [8, 384], strides = [1, 1]} : vector<8x422xf32> to vector<8x384xf32>
    %150 = vector.extract_strided_slice %133 {offsets = [0, 37], sizes = [8, 384], strides = [1, 1]} : vector<8x422xf32> to vector<8x384xf32>
    %151 = vector.extract_strided_slice %133 {offsets = [0, 38], sizes = [8, 384], strides = [1, 1]} : vector<8x422xf32> to vector<8x384xf32>
    %152 = tpu.concatenate %134, %135, %136, %137, %138, %139, %140, %141, %142, %143, %144, %145, %146, %147, %148, %149 in 0 : vector<8x384xf32>, vector<8x384xf32>, vector<8x384xf32>, vector<8x384xf32>, vector<8x384xf32>, vector<8x384xf32>, vector<8x384xf32>, vector<8x384xf32>, vector<8x384xf32>, vector<8x384xf32>, vector<8x384xf32>, vector<8x384xf32>, vector<8x384xf32>, vector<8x384xf32>, vector<8x384xf32>, vector<8x384xf32> -> vector<128x384xf32>
    %153 = tpu.concatenate %150, %151 in 0 : vector<8x384xf32>, vector<8x384xf32> -> vector<16x384xf32>
    %154 = tpu.concatenate %152, %153 in 0 : vector<128x384xf32>, vector<16x384xf32> -> vector<144x384xf32>
    %c0_94 = arith.constant 0 : index
    %c0_95 = arith.constant 0 : index
    %155 = vector.load %arg6[%c0_94, %c0_95] : memref<8x144xf32, #tpu.memory_space<vmem>>, vector<8x144xf32>
    %cst_96 = arith.constant dense<0.000000e+00> : vector<8x384xf32>
    %156 = tpu.matmul %155, %154, %cst_96 {dimension_numbers = #tpu.dot_dimension_numbers<[1], [0], [0], [1], [0, 0, 1, 1], [], []>} : vector<8x144xf32>, vector<144x384xf32>, vector<8x384xf32> -> vector<8x384xf32>
    %c0_97 = arith.constant 0 : index
    %c0_98 = arith.constant 0 : index
    %157 = vector.load %arg7[%c0_97, %c0_98] : memref<8x3xf32, #tpu.memory_space<vmem>>, vector<8x1xf32>
    %158 = vector.broadcast %157 : vector<8x1xf32> to vector<8x384xf32>
    %159 = arith.addf %156, %158 : vector<8x384xf32>
    %cst_99 = arith.constant 0.000000e+00 : f32
    %160 = vector.broadcast %cst_99 : f32 to vector<8x384xf32>
    %161 = arith.maximumf %159, %160 : vector<8x384xf32>
    %c0_100 = arith.constant 0 : index
    %c1_101 = arith.constant 1 : index
    %162 = vector.load %arg7[%c0_100, %c1_101] : memref<8x3xf32, #tpu.memory_space<vmem>>, vector<8x1xf32>
    %163 = vector.broadcast %162 : vector<8x1xf32> to vector<8x384xf32>
    %164 = arith.mulf %163, %161 : vector<8x384xf32>
    %cst_102 = arith.constant dense<0.000000e+00> : vector<384xf32>
    %165 = vector.multi_reduction <add>, %164, %cst_102 [0] : vector<8x384xf32> to vector<384xf32>
    %166 = vector.shape_cast %165 : vector<384xf32> to vector<1x384xf32>
    %c0_103 = arith.constant 0 : index
    %c2_104 = arith.constant 2 : index
    %167 = vector.load %arg7[%c0_103, %c2_104] : memref<8x3xf32, #tpu.memory_space<vmem>>, vector<1x1xf32>
    %168 = vector.broadcast %167 : vector<1x1xf32> to vector<1x384xf32>
    %169 = arith.addf %166, %168 : vector<1x384xf32>
    %170 = arith.negf %169 : vector<1x384xf32>
    %171 = math.exp %170 : vector<1x384xf32>
    %cst_105 = arith.constant 1.000000e+00 : f32
    %172 = vector.broadcast %cst_105 : f32 to vector<1x384xf32>
    %173 = arith.addf %172, %171 : vector<1x384xf32>
    %174 = arith.divf %172, %173 : vector<1x384xf32>
    %175 = vector.extract_strided_slice %132 {offsets = [0, 19], sizes = [8, 384], strides = [1, 1]} : vector<8x422xf32> to vector<8x384xf32>
    %176 = vector.extract_strided_slice %133 {offsets = [0, 19], sizes = [8, 384], strides = [1, 1]} : vector<8x422xf32> to vector<8x384xf32>
    %177 = vector.broadcast %174 : vector<1x384xf32> to vector<8x384xf32>
    %178 = arith.mulf %176, %177 : vector<8x384xf32>
    %179 = arith.addf %175, %178 : vector<8x384xf32>
    %c0_106 = arith.constant 0 : index
    %c0_107 = arith.constant 0 : index
    %180 = vector.load %arg16[%c0_106, %c0_107] : memref<8x422xf32, #tpu.memory_space<vmem>>, vector<8x422xf32>
    tpu.vector_store %arg16[%c0_106, %c0_107], %0 {strides = array<i32>} : memref<8x422xf32, #tpu.memory_space<vmem>>, vector<8x422xf32>,
    %c0_108 = arith.constant 0 : index
    %c19_109 = arith.constant 19 : index
    %181 = vector.load %arg16[%c0_108, %c19_109] : memref<8x422xf32, #tpu.memory_space<vmem>>, vector<8x384xf32>
    tpu.vector_store %arg16[%c0_108, %c19_109], %179 {strides = array<i32>} : memref<8x422xf32, #tpu.memory_space<vmem>>, vector<8x384xf32>,
    %c0_110 = arith.constant 0 : index
    %c0_111 = arith.constant 0 : index
    %182 = vector.load %arg16[%c0_110, %c0_111] : memref<8x422xf32, #tpu.memory_space<vmem>>, vector<8x422xf32>
    %183 = vector.extract_strided_slice %182 {offsets = [0, 0], sizes = [8, 384], strides = [1, 1]} : vector<8x422xf32> to vector<8x384xf32>
    %184 = vector.extract_strided_slice %182 {offsets = [0, 1], sizes = [8, 384], strides = [1, 1]} : vector<8x422xf32> to vector<8x384xf32>
    %185 = vector.extract_strided_slice %182 {offsets = [0, 2], sizes = [8, 384], strides = [1, 1]} : vector<8x422xf32> to vector<8x384xf32>
    %186 = vector.extract_strided_slice %182 {offsets = [0, 18], sizes = [8, 384], strides = [1, 1]} : vector<8x422xf32> to vector<8x384xf32>
    %187 = vector.extract_strided_slice %182 {offsets = [0, 19], sizes = [8, 384], strides = [1, 1]} : vector<8x422xf32> to vector<8x384xf32>
    %188 = vector.extract_strided_slice %182 {offsets = [0, 20], sizes = [8, 384], strides = [1, 1]} : vector<8x422xf32> to vector<8x384xf32>
    %189 = vector.extract_strided_slice %182 {offsets = [0, 36], sizes = [8, 384], strides = [1, 1]} : vector<8x422xf32> to vector<8x384xf32>
    %190 = vector.extract_strided_slice %182 {offsets = [0, 37], sizes = [8, 384], strides = [1, 1]} : vector<8x422xf32> to vector<8x384xf32>
    %191 = vector.extract_strided_slice %182 {offsets = [0, 38], sizes = [8, 384], strides = [1, 1]} : vector<8x422xf32> to vector<8x384xf32>
    %192 = tpu.concatenate %183, %184, %185, %186, %187, %188, %189, %190, %191 in 0 : vector<8x384xf32>, vector<8x384xf32>, vector<8x384xf32>, vector<8x384xf32>, vector<8x384xf32>, vector<8x384xf32>, vector<8x384xf32>, vector<8x384xf32>, vector<8x384xf32> -> vector<72x384xf32>
    %c0_112 = arith.constant 0 : index
    %c0_113 = arith.constant 0 : index
    %193 = vector.load %arg8[%c0_112, %c0_113] : memref<8x72xf32, #tpu.memory_space<vmem>>, vector<8x72xf32>
    %cst_114 = arith.constant dense<0.000000e+00> : vector<8x384xf32>
    %194 = tpu.matmul %193, %192, %cst_114 {dimension_numbers = #tpu.dot_dimension_numbers<[1], [0], [0], [1], [0, 0, 1, 1], [], []>} : vector<8x72xf32>, vector<72x384xf32>, vector<8x384xf32> -> vector<8x384xf32>
    %c0_115 = arith.constant 0 : index
    %c0_116 = arith.constant 0 : index
    %195 = vector.load %arg9[%c0_115, %c0_116] : memref<8x6xf32, #tpu.memory_space<vmem>>, vector<8x1xf32>
    %196 = vector.broadcast %195 : vector<8x1xf32> to vector<8x384xf32>
    %197 = arith.addf %194, %196 : vector<8x384xf32>
    %cst_117 = arith.constant 0.000000e+00 : f32
    %198 = vector.broadcast %cst_117 : f32 to vector<8x384xf32>
    %199 = arith.maximumf %197, %198 : vector<8x384xf32>
    %c0_118 = arith.constant 0 : index
    %c1_119 = arith.constant 1 : index
    %200 = vector.load %arg9[%c0_118, %c1_119] : memref<8x6xf32, #tpu.memory_space<vmem>>, vector<8x1xf32>
    %201 = vector.broadcast %200 : vector<8x1xf32> to vector<8x384xf32>
    %202 = arith.mulf %199, %201 : vector<8x384xf32>
    %c0_120 = arith.constant 0 : index
    %c2_121 = arith.constant 2 : index
    %203 = vector.load %arg9[%c0_120, %c2_121] : memref<8x6xf32, #tpu.memory_space<vmem>>, vector<8x1xf32>
    %204 = vector.broadcast %203 : vector<8x1xf32> to vector<8x384xf32>
    %205 = arith.addf %202, %204 : vector<8x384xf32>
    %206 = vector.broadcast %72 : vector<1x384xf32> to vector<8x384xf32>
    %207 = arith.mulf %205, %206 : vector<8x384xf32>
    %cst_122 = arith.constant 0.000000e+00 : f32
    %208 = vector.broadcast %cst_122 : f32 to vector<8x422xf32>
    %c0_123 = arith.constant 0 : index
    %c0_124 = arith.constant 0 : index
    %209 = vector.load %arg17[%c0_123, %c0_124] : memref<8x422xf32, #tpu.memory_space<vmem>>, vector<8x422xf32>
    tpu.vector_store %arg17[%c0_123, %c0_124], %208 {strides = array<i32>} : memref<8x422xf32, #tpu.memory_space<vmem>>, vector<8x422xf32>,
    %c0_125 = arith.constant 0 : index
    %c19_126 = arith.constant 19 : index
    %210 = vector.load %arg17[%c0_125, %c19_126] : memref<8x422xf32, #tpu.memory_space<vmem>>, vector<8x384xf32>
    tpu.vector_store %arg17[%c0_125, %c19_126], %207 {strides = array<i32>} : memref<8x422xf32, #tpu.memory_space<vmem>>, vector<8x384xf32>,
    %c0_127 = arith.constant 0 : index
    %c0_128 = arith.constant 0 : index
    %211 = vector.load %arg17[%c0_127, %c0_128] : memref<8x422xf32, #tpu.memory_space<vmem>>, vector<8x422xf32>
    %212 = vector.extract_strided_slice %211 {offsets = [0, 0], sizes = [8, 384], strides = [1, 1]} : vector<8x422xf32> to vector<8x384xf32>
    %213 = vector.extract_strided_slice %211 {offsets = [0, 1], sizes = [8, 384], strides = [1, 1]} : vector<8x422xf32> to vector<8x384xf32>
    %214 = vector.extract_strided_slice %211 {offsets = [0, 2], sizes = [8, 384], strides = [1, 1]} : vector<8x422xf32> to vector<8x384xf32>
    %215 = vector.extract_strided_slice %211 {offsets = [0, 18], sizes = [8, 384], strides = [1, 1]} : vector<8x422xf32> to vector<8x384xf32>
    %216 = vector.extract_strided_slice %211 {offsets = [0, 19], sizes = [8, 384], strides = [1, 1]} : vector<8x422xf32> to vector<8x384xf32>
    %217 = vector.extract_strided_slice %211 {offsets = [0, 20], sizes = [8, 384], strides = [1, 1]} : vector<8x422xf32> to vector<8x384xf32>
    %218 = vector.extract_strided_slice %211 {offsets = [0, 36], sizes = [8, 384], strides = [1, 1]} : vector<8x422xf32> to vector<8x384xf32>
    %219 = vector.extract_strided_slice %211 {offsets = [0, 37], sizes = [8, 384], strides = [1, 1]} : vector<8x422xf32> to vector<8x384xf32>
    %220 = vector.extract_strided_slice %211 {offsets = [0, 38], sizes = [8, 384], strides = [1, 1]} : vector<8x422xf32> to vector<8x384xf32>
    %221 = tpu.concatenate %212, %213, %214, %215, %216, %217, %218, %219, %220 in 0 : vector<8x384xf32>, vector<8x384xf32>, vector<8x384xf32>, vector<8x384xf32>, vector<8x384xf32>, vector<8x384xf32>, vector<8x384xf32>, vector<8x384xf32>, vector<8x384xf32> -> vector<72x384xf32>
    %c0_129 = arith.constant 0 : index
    %c0_130 = arith.constant 0 : index
    %222 = vector.load %arg10[%c0_129, %c0_130] : memref<8x72xf32, #tpu.memory_space<vmem>>, vector<8x72xf32>
    %cst_131 = arith.constant dense<0.000000e+00> : vector<8x384xf32>
    %223 = tpu.matmul %222, %221, %cst_131 {dimension_numbers = #tpu.dot_dimension_numbers<[1], [0], [0], [1], [0, 0, 1, 1], [], []>} : vector<8x72xf32>, vector<72x384xf32>, vector<8x384xf32> -> vector<8x384xf32>
    %c0_132 = arith.constant 0 : index
    %c3_133 = arith.constant 3 : index
    %224 = vector.load %arg9[%c0_132, %c3_133] : memref<8x6xf32, #tpu.memory_space<vmem>>, vector<8x1xf32>
    %225 = vector.broadcast %224 : vector<8x1xf32> to vector<8x384xf32>
    %226 = arith.addf %223, %225 : vector<8x384xf32>
    %cst_134 = arith.constant 0.000000e+00 : f32
    %227 = vector.broadcast %cst_134 : f32 to vector<8x384xf32>
    %228 = arith.maximumf %226, %227 : vector<8x384xf32>
    %c0_135 = arith.constant 0 : index
    %c4_136 = arith.constant 4 : index
    %229 = vector.load %arg9[%c0_135, %c4_136] : memref<8x6xf32, #tpu.memory_space<vmem>>, vector<8x1xf32>
    %230 = vector.broadcast %229 : vector<8x1xf32> to vector<8x384xf32>
    %231 = arith.mulf %228, %230 : vector<8x384xf32>
    %c0_137 = arith.constant 0 : index
    %c5_138 = arith.constant 5 : index
    %232 = vector.load %arg9[%c0_137, %c5_138] : memref<8x6xf32, #tpu.memory_space<vmem>>, vector<8x1xf32>
    %233 = vector.broadcast %232 : vector<8x1xf32> to vector<8x384xf32>
    %234 = arith.addf %231, %233 : vector<8x384xf32>
    %c0_139 = arith.constant 0 : index
    %c0_140 = arith.constant 0 : index
    %c0_141 = arith.constant 0 : index
    %235 = vector.load %arg12[%c0_139, %c0_140, %c0_141] : memref<1x8x384xf32, #tpu.memory_space<vmem>>, vector<1x8x384xf32>
    %236 = vector.shape_cast %235 : vector<1x8x384xf32> to vector<8x384xf32>
    %237 = vector.shape_cast %234 : vector<8x384xf32> to vector<1x8x384xf32>
    tpu.vector_store %arg12[%c0_139, %c0_140, %c0_141], %237 {strides = array<i32>} : memref<1x8x384xf32, #tpu.memory_space<vmem>>, vector<1x8x384xf32>,
    return
  }
  func.func @transform_0(%arg0: i32) -> (i32, i32, i32) {
    %c0_i32 = arith.constant 0 : i32
    %c0_i32_0 = arith.constant 0 : i32
    %c0_i32_1 = arith.constant 0 : i32
    return %arg0, %c0_i32, %c0_i32_0 : i32, i32, i32
  }
  func.func @transform_1(%arg0: i32) -> (i32, i32, i32) {
    %c0_i32 = arith.constant 0 : i32
    %c0_i32_0 = arith.constant 0 : i32
    %c0_i32_1 = arith.constant 0 : i32
    return %arg0, %c0_i32, %c0_i32_0 : i32, i32, i32
  }
  func.func @transform_2(%arg0: i32) -> (i32, i32) {
    %c0_i32 = arith.constant 0 : i32
    %c0_i32_0 = arith.constant 0 : i32
    %c0_i32_1 = arith.constant 0 : i32
    return %c0_i32, %c0_i32_0 : i32, i32
  }
  func.func @transform_3(%arg0: i32) -> (i32, i32) {
    %c0_i32 = arith.constant 0 : i32
    %c0_i32_0 = arith.constant 0 : i32
    %c0_i32_1 = arith.constant 0 : i32
    return %c0_i32, %c0_i32_0 : i32, i32
  }
  func.func @transform_4(%arg0: i32) -> (i32, i32) {
    %c0_i32 = arith.constant 0 : i32
    %c0_i32_0 = arith.constant 0 : i32
    %c0_i32_1 = arith.constant 0 : i32
    return %c0_i32, %c0_i32_0 : i32, i32
  }
  func.func @transform_5(%arg0: i32) -> (i32, i32) {
    %c0_i32 = arith.constant 0 : i32
    %c0_i32_0 = arith.constant 0 : i32
    %c0_i32_1 = arith.constant 0 : i32
    return %c0_i32, %c0_i32_0 : i32, i32
  }
  func.func @transform_6(%arg0: i32) -> (i32, i32) {
    %c0_i32 = arith.constant 0 : i32
    %c0_i32_0 = arith.constant 0 : i32
    %c0_i32_1 = arith.constant 0 : i32
    return %c0_i32, %c0_i32_0 : i32, i32
  }
  func.func @transform_7(%arg0: i32) -> (i32, i32) {
    %c0_i32 = arith.constant 0 : i32
    %c0_i32_0 = arith.constant 0 : i32
    %c0_i32_1 = arith.constant 0 : i32
    return %c0_i32, %c0_i32_0 : i32, i32
  }
  func.func @transform_8(%arg0: i32) -> (i32, i32) {
    %c0_i32 = arith.constant 0 : i32
    %c0_i32_0 = arith.constant 0 : i32
    %c0_i32_1 = arith.constant 0 : i32
    return %c0_i32, %c0_i32_0 : i32, i32
  }
  func.func @transform_9(%arg0: i32) -> (i32, i32) {
    %c0_i32 = arith.constant 0 : i32
    %c0_i32_0 = arith.constant 0 : i32
    %c0_i32_1 = arith.constant 0 : i32
    return %c0_i32, %c0_i32_0 : i32, i32
  }
  func.func @transform_10(%arg0: i32) -> (i32, i32) {
    %c0_i32 = arith.constant 0 : i32
    %c0_i32_0 = arith.constant 0 : i32
    %c0_i32_1 = arith.constant 0 : i32
    return %c0_i32, %c0_i32_0 : i32, i32
  }
  func.func @transform_11(%arg0: i32) -> (i32, i32, i32) {
    %c0_i32 = arith.constant 0 : i32
    %c0_i32_0 = arith.constant 0 : i32
    %c0_i32_1 = arith.constant 0 : i32
    return %arg0, %c0_i32, %c0_i32_0 : i32, i32, i32
  }
}

</mosaic_0001>

<bundles_post_ra>
// kernel: decoder_forward_pallas.1
= control target key start
LH: loop header
LB: loop body
LE: loop exit
PB: predicated region body
PF: predicated region fallthrough
CT: control target
= control target key end

     0   :  { %s3570_s17 = smov 0   ;;  %s4274_s0 = inlined_call_operand.vmem [shape: f32[2,8,64], index: 0, kind: input, shape index: {}]   ;;  %s4275_s1 = inlined_call_operand.vmem [shape: f32[2,8,256], index: 1, kind: input, shape index: {}]   ;;  %s4276_s2 = inlined_call_operand.vmem [shape: f32[8,16], index: 2, kind: input, shape index: {}]   ;;  %s4277_s3 = inlined_call_operand.vmem [shape: f32[8,11], index: 3, kind: input, shape index: {}]   ;;  %s4278_s4 = inlined_call_operand.vmem [shape: f32[8,8], index: 4, kind: input, shape index: {}]   ;;  %s4279_s5 = inlined_call_operand.vmem [shape: f32[8,144], index: 5, kind: input, shape index: {}]   ;;  %s4280_s6 = inlined_call_operand.vmem [shape: f32[8,3], index: 6, kind: input, shape index: {}]   ;;  %s4281_s7 = inlined_call_operand.vmem [shape: f32[8,72], index: 7, kind: input, shape index: {}]   ;;  %s4282_s8 = inlined_call_operand.vmem [shape: f32[8,6], index: 8, kind: input, shape index: {}]   ;;  %s4283_s9 = inlined_call_operand.vmem [shape: f32[8,72], index: 9, kind: input, shape index: {}]   ;;  %s4284_s10 = inlined_call_operand.vmem [shape: f32[1,384], index: 10, kind: input, shape index: {}]   ;;  %s4285_s11 = inlined_call_operand.vmem [shape: f32[2,8,384], index: 11, kind: output, shape index: {}]  }
   0x1 LB: > { %s2783_s18 = sadd.s32 4294967295, %s3457_s17   ;;  %p2787_p0 = scmp.ge.s32.totalorder %s3457_s17, 1  ;;  %s3457_s17 = sphi %s3570_s17, %s21_s17  }
   0x2   : > { %p346_p1 = scmp.lt.s32.totalorder %s3457_s17, 3 }
   0x4   : > { %p347_p2 = pnand %p2787_p0, %p346_p1 }
   0x5   : > { %p3578_p3 = scmp.lt.s32.totalorder (!%p347_p2), %s2783_s18, 1  ;;  %v3585_v0 = vld [vmem:[%s4276_s2] sm:$0xff] (!%p347_p2)  ;;  %v3459_v1 = vmov (!%p347_p2), 0.0   ;;  %vm4286_vm0 = vmmov (!%p347_p2), 0   ;;  %vm411_vm1 = vcmask (!%p347_p2), 64512   ;;  %s3461_s26 = smov (!%p347_p2), 120  }
   0x6   : > { %350 = sbr.rel (%p347_p2) target bundleno = 2466 (0x9a2), region = 64  ;;  %2852 = vmatprep.subr.mxu0 (!%p347_p2), %v3459_v1  ;;  %404 = vst [vmem:[#allocation2] sm:$0xff] (!%p347_p2), %v3459_v1  ;;  %405 = vst [vmem:[#allocation2 + $0x8] sm:$0xff] (!%p347_p2), %v3459_v1  ;;  %2854 = vmatprep.mubr.msk.f32.mxu0 (!%p347_p2), %vm4286_vm0, %v3459_v1  ;;  %s3462_s27 = smov (!%p347_p2), 104   ;;  %v3463_v3 = vmov (!%p347_p2), 1   ;;  %v3464_v4 = vmov (!%p347_p2), 2  }
   0x7   : > { %406 = vst [vmem:[#allocation2 + $0x10] sm:$0xff] (!%p347_p2), %v3459_v1  ;;  %1090 = vst [vmem:[#allocation3] sm:$0xff] (!%p347_p2), %v3459_v1  ;;  %2853 = vmatpush3.msra.mxu0 (!%p347_p2), %v3585_v0  ;;  %2857 = vmatprep.subr.mxu1 (!%p347_p2), %v3459_v1  ;;  %s3465_s28 = smov (!%p347_p2), 112   ;;  %s3466_s29 = smov (!%p347_p2), 96   ;;  %v3624_v5 = vld [vmem:[%s4277_s3] sm:$0xff] (!%p347_p2)  ;;  %v3472_v15 = vmov (!%p347_p2), 3  }
   0x8   : > { %1091 = vst [vmem:[#allocation3 + $0x8] sm:$0xff] (!%p347_p2), %v3459_v1  ;;  %1092 = vst [vmem:[#allocation3 + $0x10] sm:$0xff] (!%p347_p2), %v3459_v1  ;;  %2858 = vmatpush3.msra.mxu1 (!%p347_p2), %v3585_v0  ;;  %2859 = vmatprep.mubr.msk.f32.mxu1 (!%p347_p2), %vm4286_vm0, %v3459_v1  ;;  %s3467_s30 = smov (!%p347_p2), 80   ;;  %s3468_s12 = smov (!%p347_p2), 88   ;;  %v3473_v16 = vmov (!%p347_p2), 4   ;;  %vm407_vm2 = vcmask (!%p347_p2), 310272  }
   0x9   : > { %1595 = vst [vmem:[#allocation4] sm:$0xff] (!%p347_p2), %v3459_v1  ;;  %2102 = vst [vmem:[#allocation5] sm:$0xff] (!%p347_p2), %v3459_v1  ;;  %2862 = vmatprep.subr.mxu0 (!%p347_p2), %v3459_v1  ;;  %2867 = vmatprep.subr.mxu1 (!%p347_p2), %v3459_v1  ;;  %s3469_s15 = smov (!%p347_p2), 72   ;;  %s3470_s16 = smov (!%p347_p2), 38   ;;  %vm489_vm3 = vcmask (!%p347_p2), 441648   ;;  %vm494_vm4 = vcmask (!%p347_p2), 589248  }
   0xa   : > { %2402 = vst [vmem:[#allocation6] sm:$0xff] (!%p347_p2), %v3459_v1  ;;  %3118 = vset.pattern.permute.xlu0 (!%p347_p2), %v3463_v3  ;;  %3119 = vset.pattern.permute.xlu1 (!%p347_p2), %v3464_v4  ;;  %s3471_s19 = smov (!%p347_p2), 56   ;;  %408 = vst.msk [vmem:[#allocation2 + $0x18] sm:$0xff] (!%p347_p2), %vm407_vm2, %v3459_v1  ;;  %s3474_s20 = smov (!%p347_p2), 92   ;;  %vm661_vm5 = vcmask (!%p347_p2), 130048   ;;  %v3486_v35 = vmov (!%p347_p2), 5  }
   0xb   : > { %1093 = vst.msk [vmem:[#allocation3 + $0x18] sm:$0xff] (!%p347_p2), %vm407_vm2, %v3459_v1  ;;  %1598 = vst.msk [vmem:[#allocation4 + $0x18] sm:$0xff] (!%p347_p2), %vm407_vm2, %v3459_v1  ;;  %s3475_s21 = smov (!%p347_p2), 74   ;;  %s3477_s23 = smov (!%p347_p2), 36   ;;  %v3487_v36 = vmov (!%p347_p2), 7   ;;  %v3488_v37 = vmov (!%p347_p2), 6  }
   0xc   : > { %2105 = vst.msk [vmem:[#allocation5 + $0x18] sm:$0xff] (!%p347_p2), %vm407_vm2, %v3459_v1  ;;  %2405 = vst.msk [vmem:[#allocation6 + $0x18] sm:$0xff] (!%p347_p2), %vm407_vm2, %v3459_v1  ;;  %s3478_s24 = smov (!%p347_p2), 18   ;;  %v3489_v38 = vmov (!%p347_p2), 9   ;;  %v3490_v39 = vmov (!%p347_p2), 8   ;;  %v3491_v41 = vmov (!%p347_p2), 0  }
   0xd   : > { %s4328_s18 = smov (!%p3578_p3, %s2783_s18), 1  ;;  %s3492_s13 = smov 127   ;;  %vm4296_vm6 = vcmask 736848   ;;  %vm4289_vm7 = vcmask 884448   ;;  %vm4288_vm8 = vcmask 1032048   ;;  %vm741_vm9 = vcmask 277648  }
   0xe   : > { %s2788_s22 = sshll.u32 %s4328_s18, 3  ;;  %vm746_vm10 = vcmask 425248   ;;  %vm826_vm11 = vcmask 572848   ;;  %vm998_vm12 = vcmask 113664   ;;  %vm831_vm13 = vcmask 720448   ;;  %s3493_s14 = smov 109  }
   0xf   : > { %s393_s25 = scalar_lea.vmem %s4274_s0, %s2788_s22  ;;  %s3476_s22 = smov 110   ;;  %vm4299_vm14 = vcmask 868048   ;;  %vm4300_vm15 = vcmask 261248   ;;  %vm4295_vm2 = vcmask 408848  }
  0x10   : > { %v409_v2 = vld [vmem:[%s393_s25] sm:$0xff]  ;;  %s3479_s25 = smov 54  }
  0x11   : > { %496 = vrot.lane.b32.xlu0 %v409_v2, %s3461_s26  ;;  %663 = vrot.lane.b32.xlu1 %v409_v2, %s3462_s27  ;;  %s3480_s26 = smov 126   ;;  %s3481_s27 = smov 90   ;;  %v3690_v40 = vld [vmem:[#allocation2 + $0x18] sm:$0xff] }
  0x12   : > { %2855 = vmatmul.mubr.msk.f32.vlgmr.msra.gmra.mrb[0].mxu0 %vm411_vm1, %v409_v2 }
  0x13   : > { %2863 = vmatpush3.msra.mxu0 %v3585_v0  ;;  %2864 = vmatprep.mubr.msk.f32.mxu0 %vm4286_vm0, %v3459_v1 }
  0x14   : > { %2872 = vmatprep.subr.mxu0 %v3459_v1 }
  0x15   : > { %581 = vrot.lane.b32.xlu0 %v409_v2, %s3465_s28  ;;  %748 = vrot.lane.b32.xlu1 %v409_v2, %s3466_s29  ;;  %s3482_s28 = smov 16   ;;  %s3483_s29 = smov 34  }
  0x19   : > { %918 = vrot.lane.b32.xlu1 %v409_v2, %s3467_s30  ;;  %833 = vrot.lane.b32.xlu0 %v409_v2, %s3468_s12  ;;  %s4292_s30 = smov 108   ;;  %s3485_s12 = smov 52  }
  0x1d   : > { %1005 = vrot.lane.b32.xlu0 %v409_v2, %s3469_s15  ;;  %1208 = vperm.xlu1 %3119, %v3624_v5  }
  0x21   : > { %1178 = vperm.xlu0 %3118, %v3624_v5   ;;  %3120 = vset.pattern.permute.xlu1 %v3472_v15 }
  0x25   : > { %3121 = vset.pattern.permute.xlu0 %v3473_v16 }
  0x83   : > { %v497_v6 = vpop.permute.xlu0 %496  ;;  %v664_v7 = vpop.permute.xlu1 %663 }
  0x84   : > { %2860 = vmatmul.mubr.msk.f32.vlgmr.msra.gmra.mrb[0].mxu1 %vm411_vm1, %v497_v6 }
  0x85   : > { %2868 = vmatpush3.msra.mxu1 %v3585_v0  ;;  %2869 = vmatprep.mubr.msk.f32.mxu1 %vm4286_vm0, %v3459_v1 }
  0x86   : > { %2877 = vmatprep.subr.mxu1 %v3459_v1 }
  0x87   : > { %v582_v8 = vpop.permute.xlu0 %581  ;;  %v749_v9 = vpop.permute.xlu1 %748 }
  0x88   : > { %2865 = vmatmul.mubr.msk.f32.vlgmr.msra.gmra.mrb[2].mxu0 %vm411_vm1, %v582_v8  ;;  %2870 = vmatmul.mubr.msk.f32.vlgmr.msra.gmra.mrb[2].mxu1 %vm411_vm1, %v664_v7 }
  0x89   : > { %2873 = vmatpush3.msra.mxu0 %v3585_v0  ;;  %2874 = vmatprep.mubr.msk.f32.mxu0 %vm4286_vm0, %v3459_v1 }
  0x8a   : > { %2882 = vmatprep.subr.mxu0 %v3459_v1  ;;  %2878 = vmatpush3.msra.mxu1 %v3585_v0 }
  0x8b   : > { %2879 = vmatprep.mubr.msk.f32.mxu1 %vm4286_vm0, %v3459_v1  ;;  %v834_v10 = vpop.permute.xlu0 %833  ;;  %2887 = vmatprep.subr.mxu1 %v3459_v1  ;;  %v919_v11 = vpop.permute.xlu1 %918 }
  0x8c   : > { %2875 = vmatmul.mubr.msk.f32.vlgmr.msra.gmra.mrb[4].mxu0 %vm411_vm1, %v749_v9  ;;  %2880 = vmatmul.mubr.msk.f32.vlgmr.msra.gmra.mrb[4].mxu1 %vm411_vm1, %v834_v10 }
  0x8d   : > { %2883 = vmatpush3.msra.mxu0 %v3585_v0  ;;  %2884 = vmatprep.mubr.msk.f32.mxu0 %vm4286_vm0, %v3459_v1 }
  0x8e   : > { %2888 = vmatpush3.msra.mxu1 %v3585_v0  ;;  %2889 = vmatprep.mubr.msk.f32.mxu1 %vm4286_vm0, %v3459_v1 }
  0x8f   : > { %v1006_v12 = vpop.permute.xlu0 %1005  ;;  %2892 = vmatprep.subr.mxu1 %v3459_v1 }
  0x90   : > { %2885 = vmatmul.mubr.msk.f32.vlgmr.msra.gmra.mrb[6].mxu0 %vm411_vm1, %v919_v11  ;;  %2890 = vmatmul.mubr.msk.f32.vlgmr.msra.gmra.mrb[6].mxu1 %vm411_vm1, %v1006_v12 }
  0x91   : > { %1499 = vmatprep.mubr.f32.mxu0 %v3459_v1  ;;  %2894 = vmatprep.mubr.msk.f32.mxu1 %vm4286_vm0, %v3459_v1  ;;  %vm4298_vm0 = vcmask 1015648  }
  0x9c   : > { %v3669_v18 = vpop.permute.xlu1 %1208 }
  0x9d   : > { %v1214_v43 = vmul.f32 %v3669_v18, %v3690_v40 }
  0xa0   : > { %v3667_v17 = vpop.permute.xlu0 %1178 }
  0xa1   : > { %v1184_v42 = vmul.f32 %v3667_v17, %v3690_v40 }
  0xe5   : > { %v481_v13 = vpop.f32.mrb[0].mxu0 }
  0xe6   : > { %486 = vrot.lane.b32.xlu0 %v481_v13, %s3470_s16  ;;  %v2856_v14 = vpop.f32.mrb[1].mxu0  ;;  %491 = vrot.lane.b32.xlu1 %v481_v13, %s3471_s19 }
 0x157   : > { %v566_v19 = vpop.f32.mrb[0].mxu1 }
 0x158   : > { %v2861_v20 = vpop.f32.mrb[1].mxu1  ;;  %576 = vrot.lane.b32.xlu1 %v566_v19, %s3474_s20  ;;  %571 = vrot.lane.b32.xlu0 %v566_v19, %s3475_s21  ;;  %v487_v21 = vpop.permute.xlu0 %486  ;;  %s2813_s21 = sshll.u32 %s4328_s18, 4 }
 0x159   : > { %490 = vst.msk [vmem:[#allocation2] sm:$0xff] %vm489_vm3, %v487_v21  ;;  %v492_v22 = vpop.permute.xlu1 %491 }
 0x15a   : > { %495 = vst.msk [vmem:[#allocation2] sm:$0xff] %vm494_vm4, %v492_v22 }
 0x15b   : > { %v651_v23 = vpop.f32.mrb[2].mxu0  ;;  %v733_v24 = vpop.f32.mrb[2].mxu1 }
 0x15c   : > { %662 = vst.msk [vmem:[#allocation2 + $0x8] sm:$0xff] %vm661_vm5, %v651_v23  ;;  %656 = vrot.lane.b32.xlu1 %v651_v23, %s3476_s22  ;;  %v2866_v25 = vpop.f32.mrb[3].mxu0  ;;  %v2871_v26 = vpop.f32.mrb[3].mxu1  ;;  %743 = vrot.lane.b32.xlu0 %v733_v24, %s3477_s23  ;;  %s3500_s23 = smov 42  }
 0x15f   : > { %v818_v27 = vpop.f32.mrb[4].mxu0  ;;  %v903_v28 = vpop.f32.mrb[4].mxu1 }
 0x160   : > { %738 = vrot.lane.b32.xlu1 %v733_v24, %s3478_s24  ;;  %v2876_v29 = vpop.f32.mrb[5].mxu0  ;;  %v2881_v30 = vpop.f32.mrb[5].mxu1  ;;  %s3502_s24 = smov 66  }
 0x163   : > { %v988_v31 = vpop.f32.mrb[6].mxu0  ;;  %v1075_v32 = vpop.f32.mrb[6].mxu1 }
 0x164   : > { %823 = vrot.lane.b32.xlu1 %v818_v27, %s3479_s25  ;;  %993 = vrot.lane.b32.xlu0 %v988_v31, %s3480_s26  ;;  %v2886_v33 = vpop.f32.mrb[7].mxu0  ;;  %v2891_v34 = vpop.f32.mrb[7].mxu1 }
 0x168   : > { %828 = vrot.lane.b32.xlu1 %v818_v27, %s3469_s15  ;;  %908 = vrot.lane.b32.xlu0 %v903_v28, %s3481_s27  ;;  %s4290_s15 = smov 91  }
 0x16c   : > { %1000 = vrot.lane.b32.xlu1 %v988_v31, %s3482_s28  ;;  %1080 = vrot.lane.b32.xlu0 %v1075_v32, %s3483_s29  ;;  %s398_s28 = scalar_lea.vmem %s4275_s1, %s2813_s21  ;;  %s3496_s29 = smov 48  }
 0x16d   : > { %s3499_s21 = smov 58  }
 0x170   : > { %913 = vrot.lane.b32.xlu1 %v903_v28, %s4292_s30  ;;  %1085 = vrot.lane.b32.xlu0 %v1075_v32, %s3485_s12 }
 0x174   : > { %1238 = vperm.xlu1 %3120, %v3624_v5   ;;  %1268 = vperm.xlu0 %3121, %v3624_v5  }
 0x178   : > { %3122 = vset.pattern.permute.xlu1 %v3486_v35  ;;  %3124 = vset.pattern.permute.xlu0 %v3487_v36 }
 0x179   : > { %1298 = vperm.xlu1 %3122, %v3624_v5   ;;  %1358 = vperm.xlu0 %3124, %v3624_v5  }
 0x17d   : > { %3123 = vset.pattern.permute.xlu1 %v3488_v37  ;;  %3127 = vset.pattern.permute.xlu0 %v3489_v38  ;;  %v3495_v37 = vmov 10  }
 0x17e   : > { %1328 = vperm.xlu1 %3123, %v3624_v5   ;;  %1418 = vperm.xlu0 %3127, %v3624_v5  }
 0x182   : > { %3125 = vset.pattern.permute.xlu1 %v3490_v39  ;;  %3128 = vset.pattern.permute.xlu0 %v3495_v37  ;;  %v1094_v39 = vld [vmem:[%s398_s28] sm:$0xff] }
 0x183   : > { %1388 = vperm.xlu1 %3125, %v3624_v5  }
 0x187   : > { %3126 = vset.pattern.permute.xlu1 %v3491_v41 }
 0x188   : > { %1171 = vperm.xlu1 %3126, %v3624_v5  }
 0x18c   : > { %1195 = vrot.lane.b32.xlu1 %v1184_v42, %s3492_s13 }
 0x190   : > { %1225 = vrot.lane.b32.xlu1 %v1214_v43, %s3480_s26 }
 0x1ca   : > { %v577_v44 = vpop.permute.xlu1 %576  ;;  %v572_v45 = vpop.permute.xlu0 %571 }
 0x1cb   : > { %575 = vst.msk [vmem:[#allocation2] sm:$0xff] %vm4296_vm6, %v572_v45  ;;  %vm1257_vm6 = vcmask 900096  }
 0x1cc   : > { %580 = vst.msk [vmem:[#allocation2] sm:$0xff] %vm4289_vm7, %v577_v44  ;;  %vm4297_vm7 = vcmask 1048560  }
 0x1ce   : > { %v657_v46 = vpop.permute.xlu1 %656  ;;  %v744_v47 = vpop.permute.xlu0 %743 }
 0x1cf   : > { %660 = vst.msk [vmem:[#allocation2] sm:$0xff] %vm4288_vm8, %v657_v46  ;;  %vm4294_vm8 = vcmask 556448  }
 0x1d2   : > { %v739_v48 = vpop.permute.xlu1 %738 }
 0x1d3   : > { %742 = vst.msk [vmem:[#allocation2 + $0x8] sm:$0xff] %vm741_vm9, %v739_v48 }
 0x1d4   : > { %747 = vst.msk [vmem:[#allocation2 + $0x8] sm:$0xff] %vm746_vm10, %v744_v47 }
 0x1d6   : > { %v824_v49 = vpop.permute.xlu1 %823  ;;  %v994_v50 = vpop.permute.xlu0 %993  ;;  %v3705_v51 = vld [vmem:[#allocation2] sm:$0xff] }
 0x1d7   : > { %827 = vst.msk [vmem:[#allocation2 + $0x8] sm:$0xff] %vm826_vm11, %v824_v49  ;;  %v1181_v52 = vmul.f32 %v3667_v17, %v3705_v51  ;;  %v1211_v55 = vmul.f32 %v3669_v18, %v3705_v51 }
 0x1d8   : > { %999 = vst.msk [vmem:[#allocation2 + $0x10] sm:$0xff] %vm998_vm12, %v994_v50 }
 0x1d9   : > { %1189 = vrot.lane.b32.xlu0 %v1181_v52, %s3492_s13 }
 0x1da   : > { %v829_v53 = vpop.permute.xlu1 %828  ;;  %v909_v54 = vpop.permute.xlu0 %908 }
 0x1db   : > { %832 = vst.msk [vmem:[#allocation2 + $0x8] sm:$0xff] %vm831_vm13, %v829_v53 }
 0x1dc   : > { %912 = vst.msk [vmem:[#allocation2 + $0x8] sm:$0xff] %vm4299_vm14, %v909_v54  ;;  %vm1347_vm14 = vcmask 752640  }
 0x1dd   : > { %1219 = vrot.lane.b32.xlu0 %v1211_v55, %s3480_s26 }
 0x1de   : > { %v1001_v56 = vpop.permute.xlu1 %1000  ;;  %v1081_v57 = vpop.permute.xlu0 %1080 }
 0x1df   : > { %1004 = vst.msk [vmem:[#allocation2 + $0x10] sm:$0xff] %vm4300_vm15, %v1001_v56  ;;  %vm1377_vm15 = vcmask 744448  }
 0x1e0   : > { %1084 = vst.msk [vmem:[#allocation2 + $0x10] sm:$0xff] %vm4295_vm2, %v1081_v57  ;;  %vm4301_vm2 = vcmask 1031168  }
 0x1e2   : > { %v914_v58 = vpop.permute.xlu1 %913  ;;  %v1086_v59 = vpop.permute.xlu0 %1085 }
 0x1e3   : > { %917 = vst.msk [vmem:[#allocation2 + $0x8] sm:$0xff] %vm4298_vm0, %v914_v58  ;;  %vm1317_vm0 = vcmask 883712  }
 0x1e4   : > { %1089 = vst.msk [vmem:[#allocation2 + $0x10] sm:$0xff] %vm4294_vm8, %v1086_v59  ;;  %vm1197_vm8 = vcmask 1039360  }
 0x1e5   : > { %997 = vst.msk [vmem:[#allocation2 + $0x8] sm:$0xff] %vm4297_vm7, %v994_v50  ;;  %vm1287_vm7 = vcmask 891904  }
 0x1eb   : > { %v3748_v21 = vld [vmem:[#allocation2 + $0x10] sm:$0xff] }
 0x1ec   : > { %v3736_v12 = vld [vmem:[#allocation2 + $0x8] sm:$0xff]  ;;  %v1183_v22 = vmul.f32 %v3667_v17, %v3748_v21  ;;  %v1213_v24 = vmul.f32 %v3669_v18, %v3748_v21 }
 0x1ed   : > { %v1182_v14 = vmul.f32 %v3667_v17, %v3736_v12  ;;  %v1212_v20 = vmul.f32 %v3669_v18, %v3736_v12 }
 0x1f3   : > { %v1239_v60 = vpop.permute.xlu1 %1238  ;;  %v1269_v63 = vpop.permute.xlu0 %1268 }
 0x1f4   : > { %v1244_v61 = vmul.f32 %v1239_v60, %v3690_v40  ;;  %v1241_v62 = vmul.f32 %v1239_v60, %v3705_v51  ;;  %v1274_v0 = vmul.f32 %v1269_v63, %v3690_v40  ;;  %v1271_v2 = vmul.f32 %v1269_v63, %v3705_v51 }
 0x1f5   : > { %v1242_v23 = vmul.f32 %v1239_v60, %v3736_v12  ;;  %v1272_v25 = vmul.f32 %v1269_v63, %v3736_v12  ;;  %v1243_v26 = vmul.f32 %v1239_v60, %v3748_v21  ;;  %v1273_v17 = vmul.f32 %v1269_v63, %v3748_v21 }
 0x1f6   : > { %1255 = vrot.lane.b32.xlu1 %v1244_v61, %s3476_s22  ;;  %1249 = vrot.lane.b32.xlu0 %v1241_v62, %s3476_s22 }
 0x1f8   : > { %v1299_v1 = vpop.permute.xlu1 %1298  ;;  %v1359_v8 = vpop.permute.xlu0 %1358 }
 0x1f9   : > { %v1304_v6 = vmul.f32 %v1299_v1, %v3690_v40  ;;  %v1301_v7 = vmul.f32 %v1299_v1, %v3705_v51  ;;  %v1361_v11 = vmul.f32 %v1359_v8, %v3705_v51  ;;  %v1364_v13 = vmul.f32 %v1359_v8, %v3690_v40 }
 0x1fa   : > { %1285 = vrot.lane.b32.xlu1 %v1274_v0, %s3493_s14  ;;  %1279 = vrot.lane.b32.xlu0 %v1271_v2, %s3493_s14  ;;  %v1302_v27 = vmul.f32 %v1299_v1, %v3736_v12  ;;  %v1303_v18 = vmul.f32 %v1299_v1, %v3748_v21  ;;  %v1362_v29 = vmul.f32 %v1359_v8, %v3736_v12 }
 0x1fb   : > { %v1363_v33 = vmul.f32 %v1359_v8, %v3748_v21 }
 0x1fd   : > { %v1329_v9 = vpop.permute.xlu1 %1328 }
 0x1fe   : > { %1315 = vrot.lane.b32.xlu1 %v1304_v6, %s4292_s30  ;;  %1309 = vrot.lane.b32.xlu0 %v1301_v7, %s4292_s30  ;;  %v1334_v10 = vmul.f32 %v1329_v9, %v3690_v40  ;;  %v1331_v19 = vmul.f32 %v1329_v9, %v3705_v51  ;;  %v1332_v28 = vmul.f32 %v1329_v9, %v3736_v12 }
 0x1ff   : > { %v1333_v31 = vmul.f32 %v1329_v9, %v3748_v21 }
 0x202   : > { %1345 = vrot.lane.b32.xlu1 %v1334_v10, %s3474_s20  ;;  %1369 = vrot.lane.b32.xlu0 %v1361_v11, %s4290_s15  ;;  %v1389_v30 = vpop.permute.xlu1 %1388 }
 0x203   : > { %v1392_v32 = vmul.f32 %v1389_v30, %v3736_v12  ;;  %v1391_v34 = vmul.f32 %v1389_v30, %v3705_v51  ;;  %v1393_v36 = vmul.f32 %v1389_v30, %v3748_v21  ;;  %v1394_v38 = vmul.f32 %v1389_v30, %v3690_v40  ;;  %v3796_v40 = vpop.permute.xlu0 %1418 }
 0x206   : > { %1375 = vrot.lane.b32.xlu1 %v1364_v13, %s4290_s15  ;;  %1191 = vrot.lane.b32.xlu0 %v1182_v14, %s3492_s13 }
 0x207   : > { %v1172_v42 = vpop.permute.xlu1 %1171 }
 0x208   : > { %v1174_v6 = vmul.f32 %v1172_v42, %v3705_v51  ;;  %v1175_v13 = vmul.f32 %v1172_v42, %v3736_v12 }
 0x20a   : > { %1339 = vrot.lane.b32.xlu1 %v1331_v19, %s3474_s20  ;;  %1221 = vrot.lane.b32.xlu0 %v1212_v20, %s3480_s26 }
 0x20b   : > { %v1196_v43 = vpop.permute.xlu1 %1195 }
 0x20e   : > { %1193 = vrot.lane.b32.xlu1 %v1183_v22, %s3492_s13  ;;  %1251 = vrot.lane.b32.xlu0 %v1242_v23, %s3476_s22 }
 0x20f   : > { %v1226_v45 = vpop.permute.xlu1 %1225 }
 0x212   : > { %1223 = vrot.lane.b32.xlu1 %v1213_v24, %s3480_s26  ;;  %1281 = vrot.lane.b32.xlu0 %v1272_v25, %s3493_s14 }
 0x216   : > { %1253 = vrot.lane.b32.xlu1 %v1243_v26, %s3476_s22  ;;  %1311 = vrot.lane.b32.xlu0 %v1302_v27, %s4292_s30 }
 0x21a   : > { %1283 = vrot.lane.b32.xlu1 %v1273_v17, %s3493_s14  ;;  %1341 = vrot.lane.b32.xlu0 %v1332_v28, %s3474_s20  ;;  %v1176_v17 = vmul.f32 %v1172_v42, %v3748_v21 }
 0x21e   : > { %1313 = vrot.lane.b32.xlu1 %v1303_v18, %s4292_s30  ;;  %1371 = vrot.lane.b32.xlu0 %v1362_v29, %s4290_s15  ;;  %s3498_s30 = smov 62  }
 0x222   : > { %1343 = vrot.lane.b32.xlu1 %v1333_v31, %s3474_s20  ;;  %1401 = vrot.lane.b32.xlu0 %v1392_v32, %s3481_s27 }
 0x226   : > { %1373 = vrot.lane.b32.xlu1 %v1363_v33, %s4290_s15  ;;  %1399 = vrot.lane.b32.xlu0 %v1391_v34, %s3481_s27  ;;  %s3497_s15 = smov 50  }
 0x22a   : > { %1403 = vrot.lane.b32.xlu1 %v1393_v36, %s3481_s27  ;;  %1429 = vperm.xlu0 %3128, %v3624_v5   ;;  %v1095_v5 = vld [vmem:[%s398_s28 + $0x8] sm:$0xff]  ;;  %s3506_s28 = smov 44  }
 0x22e   : > { %1405 = vrot.lane.b32.xlu1 %v1394_v38, %s3481_s27  ;;  %1125 = vrot.lane.b32.xlu0 %v1094_v39, %s3485_s12  ;;  %s3501_s12 = smov 40  }
 0x22f   : > { %3289 = vset.pattern.permute.xlu0 %v3463_v3 }
 0x232   : > { %1117 = vrot.lane.b32.xlu1 %v1094_v39, %s3496_s29  ;;  %1097 = vrot.lane.b32.xlu0 %v1094_v39, %s3470_s16  ;;  %s3503_s29 = smov 64   ;;  %s3504_s16 = smov 68  }
 0x236   : > { %1121 = vrot.lane.b32.xlu1 %v1094_v39, %s3497_s15  ;;  %1146 = vrot.lane.b32.xlu0 %v1095_v5, %s3498_s30  ;;  %s3505_s15 = smov 60   ;;  %s3507_s30 = smov 46  }
 0x23a   : > { %1130 = vrot.lane.b32.xlu1 %v1095_v5, %s3479_s25  ;;  %1138 = vrot.lane.b32.xlu0 %v1095_v5, %s3499_s21 }
 0x23e   : > { %1134 = vrot.lane.b32.xlu1 %v1095_v5, %s3471_s19  ;;  %1105 = vrot.lane.b32.xlu0 %v1094_v39, %s3500_s23 }
 0x242   : > { %1101 = vrot.lane.b32.xlu1 %v1094_v39, %s3501_s12  ;;  %1155 = vrot.lane.b32.xlu0 %v1095_v5, %s3502_s24  ;;  %s3508_s12 = smov 19   ;;  %s4312_s24 = smov 108  }
 0x246   : > { %1151 = vrot.lane.b32.xlu1 %v1095_v5, %s3503_s29  ;;  %1159 = vrot.lane.b32.xlu0 %v1095_v5, %s3504_s16  ;;  %s4313_s29 = smov 91  }
 0x24a   : > { %1142 = vrot.lane.b32.xlu1 %v1095_v5, %s3505_s15 }
 0x24b   : > { %v1190_v44 = vpop.permute.xlu0 %1189 }
 0x24e   : > { %1109 = vrot.lane.b32.xlu1 %v1094_v39, %s3506_s28 }
 0x24f   : > { %v1220_v46 = vpop.permute.xlu0 %1219 }
 0x252   : > { %1113 = vrot.lane.b32.xlu1 %v1094_v39, %s3507_s30 }
 0x268   : > { %v1256_v47 = vpop.permute.xlu1 %1255  ;;  %v1250_v48 = vpop.permute.xlu0 %1249 }
 0x26c   : > { %v1286_v49 = vpop.permute.xlu1 %1285  ;;  %v1280_v50 = vpop.permute.xlu0 %1279 }
 0x270   : > { %v3798_v52 = vpop.permute.xlu1 %1315  ;;  %v1310_v53 = vpop.permute.xlu0 %1309 }
 0x274   : > { %v3800_v54 = vpop.permute.xlu1 %1345  ;;  %v1370_v55 = vpop.permute.xlu0 %1369 }
 0x278   : > { %v3802_v56 = vpop.permute.xlu1 %1375  ;;  %v1192_v57 = vpop.permute.xlu0 %1191 }
 0x279   : > { %v1198_v2 = vsel %vm1197_vm8, %v1190_v44, %v1192_v57 }
 0x27a   : > { %v1204_v10 = vadd.f32 %v1198_v2, %v1174_v6 }
 0x27c   : > { %v1340_v58 = vpop.permute.xlu1 %1339  ;;  %v1222_v59 = vpop.permute.xlu0 %1221 }
 0x27d   : > { %v1228_v7 = vsel %vm4301_vm2, %v1220_v46, %v1222_v59 }
 0x27e   : > { %v1234_v19 = vadd.f32 %v1228_v7, %v1204_v10 }
 0x280   : > { %v1194_v60 = vpop.permute.xlu1 %1193  ;;  %v1252_v61 = vpop.permute.xlu0 %1251 }
 0x281   : > { %v1199_v11 = vsel %vm1197_vm8, %v1192_v57, %v1194_v60  ;;  %v1258_v14 = vsel %vm1257_vm6, %v1250_v48, %v1252_v61  ;;  %v1200_v25 = vsel %vm1197_vm8, %v1194_v60, %v1196_v43 }
 0x282   : > { %v1205_v22 = vadd.f32 %v1199_v11, %v1175_v13  ;;  %v1264_v26 = vadd.f32 %v1258_v14, %v1234_v19  ;;  %v1206_v31 = vadd.f32 %v1200_v25, %v1176_v17  ;;  %v1427_v19 = vld [vmem:[%s4278_s4] sm:$0xff] }
 0x284   : > { %v1224_v62 = vpop.permute.xlu1 %1223  ;;  %v1282_v63 = vpop.permute.xlu0 %1281 }
 0x285   : > { %v1229_v20 = vsel %vm4301_vm2, %v1222_v59, %v1224_v62  ;;  %v1288_v51 = vsel %vm1287_vm7, %v1280_v50, %v1282_v63  ;;  %v1230_v18 = vsel %vm4301_vm2, %v1224_v62, %v1226_v45  ;;  %vm1407_vm2 = vcmask 736256  }
 0x286   : > { %v1235_v12 = vadd.f32 %v1229_v20, %v1205_v22  ;;  %v1294_v29 = vadd.f32 %v1288_v51, %v1264_v26  ;;  %v1236_v39 = vadd.f32 %v1230_v18, %v1206_v31 }
 0x288   : > { %v1254_v0 = vpop.permute.xlu1 %1253  ;;  %v1312_v1 = vpop.permute.xlu0 %1311 }
 0x289   : > { %v1259_v27 = vsel %vm1257_vm6, %v1252_v61, %v1254_v0  ;;  %v1318_v28 = vsel %vm1317_vm0, %v1310_v53, %v1312_v1  ;;  %v1260_v37 = vsel %vm1257_vm6, %v1254_v0, %v1256_v47 }
 0x28a   : > { %v1265_v32 = vadd.f32 %v1259_v27, %v1235_v12  ;;  %v1324_v38 = vadd.f32 %v1318_v28, %v1294_v29  ;;  %v1266_v46 = vadd.f32 %v1260_v37, %v1236_v39 }
 0x28c   : > { %v1284_v8 = vpop.permute.xlu1 %1283  ;;  %v1342_v9 = vpop.permute.xlu0 %1341 }
 0x28d   : > { %v1289_v30 = vsel %vm1287_vm7, %v1282_v63, %v1284_v8  ;;  %v1348_v33 = vsel %vm1347_vm14, %v1340_v58, %v1342_v9  ;;  %v1290_v43 = vsel %vm1287_vm7, %v1284_v8, %v1286_v49 }
 0x28e   : > { %v1295_v5 = vadd.f32 %v1289_v30, %v1265_v32  ;;  %v1354_v44 = vadd.f32 %v1348_v33, %v1324_v38  ;;  %v1296_v60 = vadd.f32 %v1290_v43, %v1266_v46  ;;  %v1163_v38 = vld [vmem:[%s4284_s10] sm:$0x7] }
 0x290   : > { %v1314_v23 = vpop.permute.xlu1 %1313  ;;  %v1372_v24 = vpop.permute.xlu0 %1371 }
 0x291   : > { %v1319_v21 = vsel %vm1317_vm0, %v1312_v1, %v1314_v23  ;;  %v1378_v42 = vsel %vm1377_vm15, %v1370_v55, %v1372_v24  ;;  %v1320_v47 = vsel %vm1317_vm0, %v1314_v23, %v3798_v52 }
 0x292   : > { %v1325_v48 = vadd.f32 %v1319_v21, %v1295_v5  ;;  %v1384_v57 = vadd.f32 %v1378_v42, %v1354_v44  ;;  %v1326_v62 = vadd.f32 %v1320_v47, %v1296_v60 }
 0x294   : > { %v1344_v34 = vpop.permute.xlu1 %1343  ;;  %v1402_v36 = vpop.permute.xlu0 %1401 }
 0x295   : > { %v1349_v45 = vsel %vm1347_vm14, %v1342_v9, %v1344_v34  ;;  %v1350_v49 = vsel %vm1347_vm14, %v1344_v34, %v3800_v54  ;;  %v1577_v34 = vlaneseq }
 0x296   : > { %v1355_v55 = vadd.f32 %v1349_v45, %v1325_v48  ;;  %v1356_v52 = vadd.f32 %v1350_v49, %v1326_v62  ;;  %v3884_v62 = vld [vmem:[#allocation3 + $0x18] sm:$0xff] }
 0x298   : > { %v1374_v50 = vpop.permute.xlu1 %1373  ;;  %v1400_v53 = vpop.permute.xlu0 %1399 }
 0x299   : > { %v1379_v58 = vsel %vm1377_vm15, %v1372_v24, %v1374_v50  ;;  %v1408_v59 = vsel %vm1407_vm2, %v1400_v53, %v1402_v36  ;;  %v1380_v1 = vsel %vm1377_vm15, %v1374_v50, %v3802_v56 }
 0x29a   : > { %v1414_v61 = vadd.f32 %v1408_v59, %v1384_v57  ;;  %v1385_v63 = vadd.f32 %v1379_v58, %v1355_v55  ;;  %v1386_v8 = vadd.f32 %v1380_v1, %v1356_v52 }
 0x29c   : > { %v1404_v0 = vpop.permute.xlu1 %1403  ;;  %v1421_v7 = vadd.f32 %v3796_v40, %v1414_v61 }
 0x29d   : > { %v1409_v2 = vsel %vm1407_vm2, %v1402_v36, %v1404_v0  ;;  %v1578_v36 = vshrl.u32 %v1577_v34, 7 }
 0x29e   : > { %v1415_v6 = vadd.f32 %v1409_v2, %v1385_v63  ;;  %v1424_v14 = vmax.f32 %v1421_v7, 0.0 }
 0x29f   : > { %v3859_v37 = vsub.s32 0, %v1578_v36  ;;  %v1583_v21 = vsub.s32 1, %v1578_v36  ;;  %v1587_v39 = vsub.s32 2, %v1578_v36 }
 0x2a0   : > { %v1406_v9 = vpop.permute.xlu1 %1405  ;;  %v1422_v10 = vadd.f32 %v3796_v40, %v1415_v6 }
 0x2a1   : > { %v1410_v11 = vsel %vm1407_vm2, %v1404_v0, %v1406_v9  ;;  %v3865_v5 = vrot.slane %v1163_v38, %v3859_v37  ;;  %v3867_v43 = vrot.slane %v1163_v38, %v1583_v21  ;;  %v3869_v48 = vrot.slane %v1163_v38, %v1587_v39 }
 0x2a2   : > { %v1416_v54 = vadd.f32 %v1410_v11, %v1386_v8  ;;  %v1425_v13 = vmax.f32 %v1422_v10, 0.0  ;;  %v3509_v11 = vmov 0.0|0.0  }
 0x2a4   : > { %v1423_v56 = vadd.f32 %v3796_v40, %v1416_v54  ;;  %1435 = vmatprep.subr.mxu0 %v1425_v13  ;;  %v1118_v20 = vpop.permute.xlu1 %1117 }
 0x2a5   : > { %1436 = vmatpush1.msra.mxu0 %v1424_v14  ;;  %1120 = vst.msk [vmem:[#allocation3 + $0x8] sm:$0xff] %vm661_vm5, %v1118_v20 }
 0x2a6   : > { %v1426_v22 = vmax.f32 %v1423_v56, 0.0  ;;  %2800 = vmatmul.mubr.msk.f32.vlgmr.msra.gmra.mrb[8].mxu0 %vm411_vm1, %v1427_v19 }
 0x2a8   : > { %2893 = vmatpush3.msra.mxu1 %v1426_v22  ;;  %v1122_v51 = vpop.permute.xlu1 %1121 }
 0x2a9   : > { %2895 = vmatmul.mubr.msk.f32.vlgmr.msra.gmra.mrb[8].mxu1 %vm411_vm1, %v1427_v19  ;;  %1124 = vst.msk [vmem:[#allocation3 + $0x8] sm:$0xff] %vm741_vm9, %v1122_v51  ;;  %v1430_v23 = vpop.permute.xlu0 %1429  ;;  %vm4303_vm1 = vcmask 261248   ;;  %vm4304_vm9 = vcmask 868048   ;;  %2975 = vmatprep.subr.bf16.mxu1 %v3509_v11 }
 0x2ac   : > { %v1131_v24 = vpop.permute.xlu1 %1130 }
 0x2ad   : > { %v1126_v25 = vpop.permute.xlu0 %1125 }
 0x2ae   : > { %1128 = vst.msk [vmem:[#allocation3 + $0x8] sm:$0xff] %vm746_vm10, %v1126_v25  ;;  %vm4305_vm10 = vcmask 1015648   ;;  %v1861_v25 = vld [vmem:[%s4279_s5 + $0x8] sm:$0xff] }
 0x2af   : > { %1133 = vst.msk [vmem:[#allocation3 + $0x8] sm:$0xff] %vm826_vm11, %v1131_v24  ;;  %vm4306_vm11 = vcmask 1048560   ;;  %2802 = vmatprep.mubr.msk.f32.mxu0 %vm661_vm5, %v1861_v25  ;;  %2803 = vmatprep.mubr.msk.f32.mxu1 %vm661_vm5, %v1861_v25  ;;  %vm4314_vm5 = vcmask 1031168  }
 0x2b0   : > { %v1135_v40 = vpop.permute.xlu1 %1134 }
 0x2b1   : > { %1137 = vst.msk [vmem:[#allocation3 + $0x8] sm:$0xff] %vm831_vm13, %v1135_v40  ;;  %v1098_v26 = vpop.permute.xlu0 %1097  ;;  %vm4307_vm13 = vcmask 736848  }
 0x2b2   : > { %1100 = vst.msk [vmem:[#allocation3] sm:$0xff] %vm489_vm3, %v1098_v26  ;;  %vm4308_vm3 = vcmask 884448  }
 0x2b4   : > { %v1102_v27 = vpop.permute.xlu1 %1101 }
 0x2b5   : > { %1104 = vst.msk [vmem:[#allocation3] sm:$0xff] %vm494_vm4, %v1102_v27  ;;  %v1147_v17 = vpop.permute.xlu0 %1146  ;;  %vm4309_vm4 = vcmask 408848   ;;  %v1862_v27 = vld [vmem:[%s4280_s6] sm:$0xff] }
 0x2b6   : > { %1150 = vst.msk [vmem:[#allocation3 + $0x10] sm:$0xff] %vm998_vm12, %v1147_v17  ;;  %vm4310_vm12 = vcmask 1032048  }
 0x2b8   : > { %v1152_v12 = vpop.permute.xlu1 %1151 }
 0x2b9   : > { %1154 = vst.msk [vmem:[#allocation3 + $0x10] sm:$0xff] %vm4303_vm1, %v1152_v12  ;;  %v1139_v28 = vpop.permute.xlu0 %1138  ;;  %vm4311_vm1 = vcmask 556448   ;;  %v2040_v12 = vld [vmem:[%s4280_s6] sm:$0x1] }
 0x2ba   : > { %1141 = vst.msk [vmem:[#allocation3 + $0x8] sm:$0xff] %vm4304_vm9, %v1139_v28  ;;  %vm1615_vm9 = vcmask 1047704  }
 0x2bc   : > { %v1143_v18 = vpop.permute.xlu1 %1142 }
 0x2bd   : > { %1145 = vst.msk [vmem:[#allocation3 + $0x8] sm:$0xff] %vm4305_vm10, %v1143_v18  ;;  %v1106_v29 = vpop.permute.xlu0 %1105  ;;  %vm1608_vm10 = vcmask 154624  }
 0x2be   : > { %1149 = vst.msk [vmem:[#allocation3 + $0x8] sm:$0xff] %vm4306_vm11, %v1147_v17  ;;  %vm4315_vm11 = vmmov %vm4314_vm5 }
 0x2bf   : > { %1108 = vst.msk [vmem:[#allocation3] sm:$0xff] %vm4307_vm13, %v1106_v29  ;;  %vm4316_vm13 = vmmov %vm4314_vm5 }
 0x2c0   : > { %v1110_v30 = vpop.permute.xlu1 %1109 }
 0x2c1   : > { %1112 = vst.msk [vmem:[#allocation3] sm:$0xff] %vm4308_vm3, %v1110_v30  ;;  %v1156_v31 = vpop.permute.xlu0 %1155  ;;  %vm4317_vm3 = vmmov %vm4314_vm5 }
 0x2c2   : > { %1158 = vst.msk [vmem:[#allocation3 + $0x10] sm:$0xff] %vm4309_vm4, %v1156_v31  ;;  %vm4318_vm4 = vmmov %vm4317_vm3 }
 0x2c4   : > { %v1114_v32 = vpop.permute.xlu1 %1113 }
 0x2c5   : > { %v1160_v33 = vpop.permute.xlu0 %1159  ;;  %1116 = vst.msk [vmem:[#allocation3] sm:$0xff] %vm4310_vm12, %v1114_v32  ;;  %v3872_v47 = vld [vmem:[#allocation3 + $0x8] sm:$0xff]  ;;  %vm4319_vm12 = vmmov %vm4317_vm3 }
 0x2c6   : > { %1162 = vst.msk [vmem:[#allocation3 + $0x10] sm:$0xff] %vm4311_vm1, %v1160_v33  ;;  %vm4320_vm1 = vmmov 0  }
 0x2cc   : > { %v3882_v61 = vld [vmem:[#allocation3] sm:$0xff] }
 0x2cd   : > { %v3874_v57 = vld [vmem:[#allocation3 + $0x10] sm:$0xff]  ;;  %v3134_v63 = vpack.i.bf16 %v3882_v61, %v3884_v62  ;;  %v3144_v0 = vpack.i.bf16 %v3884_v62, %v3882_v61 }
 0x2ce   : > { %v3129_v49 = vpack.i.bf16 %v3874_v57, %v3872_v47 }
 0x379   : > { %v1501_v42 = vpop.f32.mrb[8].mxu0 }
 0x37a   : > { %v1502_v44 = vadd.f32 %v1501_v42, %v1430_v23  ;;  %v1503_v45 = vpop.f32.mrb[9].mxu0 }
 0x37b   : > { %v1504_v46 = vadd.f32 %v1503_v45, %v1430_v23 }
 0x37c   : > { %v1592_v50 = vmul.f32 %v3865_v5, %v1502_v44  ;;  %v1572_v53 = vpop.f32.mrb[8].mxu1 }
 0x37d   : > { %v1593_v58 = vmul.f32 %v3867_v43, %v1504_v46  ;;  %v1573_v59 = vadd.f32 %v1572_v53, %v1430_v23  ;;  %v2896_v60 = vpop.f32.mrb[9].mxu1 }
 0x37e   : > { %1602 = vrot.lane.b32.xlu0 %v1592_v50, %s3508_s12 }
 0x37f   : > { %v1594_v55 = vmul.f32 %v3869_v48, %v1573_v59  ;;  %1604 = vrot.lane.b32.xlu1 %v1593_v58, %s3508_s12 }
 0x382   : > { %1606 = vrot.lane.b32.xlu0 %v1594_v55, %s3508_s12 }
 0x383   : > { %3130 = vrot.lane.b32.xlu1 %v3129_v49, %s3492_s13 }
 0x386   : > { %3135 = vrot.lane.b32.xlu0 %v3134_v63, %s3492_s13 }
 0x387   : > { %3140 = vrot.lane.b32.xlu1 %v3129_v49, %s3480_s26 }
 0x38a   : > { %3145 = vrot.lane.b32.xlu0 %v3144_v0, %s3480_s26 }
 0x38b   : > { %3150 = vrot.lane.b32.xlu1 %v3129_v49, %s3476_s22 }
 0x3f0   : > { %v1603_v1 = vpop.permute.xlu0 %1602 }
 0x3f1   : > { %1616 = vst.msk [vmem:[#allocation4] sm:$0xff] %vm1615_vm9, %v1603_v1  ;;  %v1605_v2 = vpop.permute.xlu1 %1604 }
 0x3f2   : > { %v3898_v52 = vsel %vm1608_vm10, %v1603_v1, %v1605_v2 }
 0x3f4   : > { %v1607_v6 = vpop.permute.xlu0 %1606 }
 0x3f5   : > { %v3901_v7 = vsel %vm1608_vm10, %v1605_v2, %v1607_v6  ;;  %1619 = vst.msk [vmem:[#allocation4 + $0x18] sm:$0xff] %vm1608_vm10, %v1607_v6  ;;  %v3131_v13 = vpop.permute.xlu1 %3130 }
 0x3f6   : > { %v3194_v54 = vpack.i.bf16 %v3901_v7, %v3898_v52  ;;  %v3133_v19 = vunpack.i.h.bf16 %v3131_v13  ;;  %v3132_v56 = vunpack.i.l.bf16 %v3131_v13 }
 0x3f8   : > { %v3904_v8 = vld [vmem:[#allocation4] sm:$0xff]  ;;  %v3136_v14 = vpop.permute.xlu0 %3135  ;;  %v3936_v51 = vsel %vm1197_vm8, %v3132_v56, %v3133_v19 }
 0x3f9   : > { %v3138_v20 = vunpack.i.h.bf16 %v3136_v14  ;;  %v3137_v22 = vunpack.i.l.bf16 %v3136_v14  ;;  %v3968_v28 = vpop.permute.xlu1 %3140 }
 0x3fa   : > { %v3143_v55 = vunpack.i.h.bf16 %v3968_v28 }
 0x3fb   : > { %v3939_v23 = vsel %vm1197_vm8, %v3138_v20, %v3132_v56  ;;  %v3942_v24 = vsel %vm1197_vm8, %v3133_v19, %v3137_v22  ;;  %v3284_v17 = vpack.i.bf16 %v3137_v22, %v3884_v62 }
 0x3fc   : > { %v3906_v9 = vld [vmem:[#allocation4 + $0x18] sm:$0xff]  ;;  %v3279_v40 = vpack.i.bf16 %v3939_v23, %v3882_v61  ;;  %v3274_v26 = vpack.i.bf16 %v3942_v24, %v3936_v51  ;;  %v3972_v29 = vpop.permute.xlu0 %3145 }
 0x3fd   : > { %v3159_v10 = vpack.i.bf16 %v3906_v9, %v3904_v8  ;;  %v3970_v18 = vpop.permute.xlu1 %3150 }
 0x3ff   : > { %3160 = vrot.lane.b32.xlu1 %v3159_v10, %s3480_s26  ;;  %3155 = vrot.lane.b32.xlu0 %v3159_v10, %s3492_s13 }
 0x403   : > { %3170 = vrot.lane.b32.xlu1 %v3159_v10, %s3493_s14  ;;  %3165 = vrot.lane.b32.xlu0 %v3159_v10, %s3476_s22 }
 0x407   : > { %3180 = vrot.lane.b32.xlu1 %v3159_v10, %s3474_s20  ;;  %3175 = vrot.lane.b32.xlu0 %v3159_v10, %s4312_s24 }
 0x40b   : > { %3185 = vrot.lane.b32.xlu0 %v3159_v10, %s4313_s29  ;;  %3195 = vrot.lane.b32.xlu1 %v3194_v54, %s3492_s13 }
 0x40f   : > { %3190 = vrot.lane.b32.xlu0 %v3159_v10, %s3481_s27  ;;  %3200 = vrot.lane.b32.xlu1 %v3194_v54, %s3480_s26 }
 0x413   : > { %3205 = vrot.lane.b32.xlu0 %v3194_v54, %s3476_s22  ;;  %3210 = vrot.lane.b32.xlu1 %v3194_v54, %s3493_s14 }
 0x417   : > { %3215 = vrot.lane.b32.xlu0 %v3194_v54, %s4312_s24  ;;  %3220 = vrot.lane.b32.xlu1 %v3194_v54, %s3474_s20 }
 0x41b   : > { %3225 = vrot.lane.b32.xlu0 %v3194_v54, %s4313_s29  ;;  %3235 = vrot.lane.b32.xlu1 %v3194_v54, %s3481_s27 }
 0x41f   : > { %3230 = vrot.lane.b32.xlu0 %v3129_v49, %s3493_s14  ;;  %3240 = vrot.lane.b32.xlu1 %v3144_v0, %s3476_s22 }
 0x423   : > { %3245 = vrot.lane.b32.xlu0 %v3144_v0, %s3493_s14  ;;  %3250 = vrot.lane.b32.xlu1 %v3129_v49, %s4312_s24 }
 0x427   : > { %3255 = vrot.lane.b32.xlu0 %v3129_v49, %s3474_s20  ;;  %3260 = vrot.lane.b32.xlu1 %v3144_v0, %s4312_s24 }
 0x42b   : > { %3265 = vrot.lane.b32.xlu0 %v3144_v0, %s3474_s20  ;;  %3270 = vrot.lane.b32.xlu1 %v3129_v49, %s4313_s29 }
 0x42f   : > { %3280 = vrot.lane.b32.xlu1 %v3279_v40, %s4313_s29  ;;  %3275 = vrot.lane.b32.xlu0 %v3274_v26, %s4313_s29 }
 0x433   : > { %1865 = vperm.xlu1 %3126, %v1862_v27   ;;  %3285 = vrot.lane.b32.xlu0 %v3284_v17, %s4313_s29 }
 0x437   : > { %2016 = vperm.xlu0 %3289, %v1862_v27   ;;  %3290 = vset.pattern.permute.xlu1 %v3464_v4 }
 0x438   : > { %2043 = vperm.xlu1 %3290, %v2040_v12  }
 0x43b   : > { %3361 = vset.pattern.permute.xlu0 %v3491_v41 }
 0x43c   : > { %3362 = vset.pattern.permute.xlu1 %v3463_v3 }
 0x471   : > { %v3161_v30 = vpop.permute.xlu1 %3160  ;;  %v3156_v31 = vpop.permute.xlu0 %3155 }
 0x472   : > { %v3158_v39 = vunpack.i.h.bf16 %v3156_v31  ;;  %v3157_v41 = vunpack.i.l.bf16 %v3156_v31  ;;  %v3163_v63 = vunpack.i.h.bf16 %v3161_v30  ;;  %v3162_v0 = vunpack.i.l.bf16 %v3161_v30 }
 0x475   : > { %v3171_v32 = vpop.permute.xlu1 %3170  ;;  %v3166_v33 = vpop.permute.xlu0 %3165 }
 0x476   : > { %v3173_v1 = vunpack.i.h.bf16 %v3171_v32  ;;  %v3168_v54 = vunpack.i.h.bf16 %v3166_v33  ;;  %v3167_v13 = vunpack.i.l.bf16 %v3166_v33  ;;  %v3172_v56 = vunpack.i.l.bf16 %v3171_v32 }
 0x479   : > { %v3974_v34 = vpop.permute.xlu1 %3180  ;;  %v3176_v36 = vpop.permute.xlu0 %3175 }
 0x47a   : > { %v3183_v20 = vunpack.i.h.bf16 %v3974_v34  ;;  %v3178_v22 = vunpack.i.h.bf16 %v3176_v36  ;;  %v3177_v12 = vunpack.i.l.bf16 %v3176_v36 }
 0x47d   : > { %v3196_v38 = vpop.permute.xlu1 %3195  ;;  %v3976_v21 = vpop.permute.xlu0 %3185 }
 0x47e   : > { %v3198_v42 = vunpack.i.h.bf16 %v3196_v38  ;;  %v3197_v3 = vunpack.i.l.bf16 %v3196_v38 }
 0x480   : > { %v1640_v44 = vsel %vm1197_vm8, %v3157_v41, %v3197_v3  ;;  %v1642_v45 = vsel %vm1197_vm8, %v3198_v42, %v3158_v39  ;;  %v1641_v46 = vsel %vm1197_vm8, %v3197_v3, %v3198_v42 }
 0x481   : > { %v2941_v50 = vpack.c.bf16 %v1640_v44, %v3904_v8  ;;  %v2976_v53 = vpack.c.bf16 %v1642_v45, %v3901_v7  ;;  %v3201_v58 = vpop.permute.xlu1 %3200  ;;  %v3983_v59 = vpop.permute.xlu0 %3190  ;;  %v2939_v60 = vpack.c.bf16 %v1641_v46, %v3898_v52  ;;  %v3188_v44 = vunpack.i.h.bf16 %v3976_v21 }
 0x482   : > { %v3203_v49 = vunpack.i.h.bf16 %v3201_v58  ;;  %v3202_v2 = vunpack.i.l.bf16 %v3201_v58  ;;  %v3187_v45 = vunpack.i.l.bf16 %v3976_v21 }
 0x483   : > { %2940 = vmatprep.subr.bf16.mxu0 %v2939_v60  ;;  %2977 = vmatpush1.bf16.msra.mxu1 %v2976_v53 }
 0x484   : > { %2942 = vmatpush1.bf16.msra.mxu0 %v2941_v50  ;;  %2978 = vmatprep.subr.bf16.mxu1 %v3509_v11  ;;  %v1656_v40 = vsel %vm4314_vm5, %v3203_v49, %v3163_v63  ;;  %v1654_v30 = vsel %vm4315_vm11, %v3162_v0, %v3202_v2  ;;  %v1655_v3 = vsel %vm4316_vm13, %v3202_v2, %v3203_v49  ;;  %vm4321_vm5 = vmmov %vm4317_vm3 }
 0x485   : > { %v3211_v6 = vpop.permute.xlu1 %3210  ;;  %v3206_v10 = vpop.permute.xlu0 %3205  ;;  %vm4322_vm11 = vmmov %vm4317_vm3 }
 0x486   : > { %v3208_v14 = vunpack.i.h.bf16 %v3206_v10  ;;  %v3207_v19 = vunpack.i.l.bf16 %v3206_v10  ;;  %v3213_v25 = vunpack.i.h.bf16 %v3211_v6  ;;  %v3212_v26 = vunpack.i.l.bf16 %v3211_v6  ;;  %vm4323_vm13 = vmmov %vm4317_vm3 }
 0x488   : > { %v1668_v27 = vsel %vm1257_vm6, %v3167_v13, %v3207_v19  ;;  %v1670_v17 = vsel %vm1257_vm6, %v3208_v14, %v3168_v54  ;;  %v1669_v39 = vsel %vm1257_vm6, %v3207_v19, %v3208_v14  ;;  %v1684_v46 = vsel %vm1287_vm7, %v3213_v25, %v3173_v1 }
 0x489   : > { %v2979_v31 = vpack.c.bf16 %v1670_v17, %v1656_v40  ;;  %v3221_v38 = vpop.permute.xlu1 %3220  ;;  %v3216_v33 = vpop.permute.xlu0 %3215  ;;  %v2945_v32 = vpack.c.bf16 %v1668_v27, %v1654_v30  ;;  %v2943_v50 = vpack.c.bf16 %v1669_v39, %v1655_v3  ;;  %v1682_v36 = vsel %vm1287_vm7, %v3172_v56, %v3212_v26 }
 0x48a   : > { %v3218_v41 = vunpack.i.h.bf16 %v3216_v33  ;;  %v3217_v42 = vunpack.i.l.bf16 %v3216_v33  ;;  %v3223_v53 = vunpack.i.h.bf16 %v3221_v38  ;;  %v3222_v63 = vunpack.i.l.bf16 %v3221_v38 }
 0x48b   : > { %2980 = vmatpush1.bf16.msra.mxu1 %v2979_v31  ;;  %2944 = vmatprep.subr.bf16.mxu0 %v2943_v50  ;;  %v1683_v21 = vsel %vm1287_vm7, %v3212_v26, %v3213_v25  ;;  %v3142_v14 = vunpack.i.l.bf16 %v3968_v28  ;;  %v3182_v19 = vunpack.i.l.bf16 %v3974_v34  ;;  %v3193_v40 = vunpack.i.h.bf16 %v3983_v59 }
 0x48c   : > { %v1696_v58 = vsel %vm1317_vm0, %v3177_v12, %v3217_v42  ;;  %v1698_v60 = vsel %vm1317_vm0, %v3218_v41, %v3178_v22  ;;  %2981 = vmatprep.subr.bf16.mxu1 %v3509_v11  ;;  %v1697_v1 = vsel %vm1317_vm0, %v3217_v42, %v3218_v41  ;;  %2946 = vmatpush1.bf16.msra.mxu0 %v2945_v32  ;;  %v3148_v34 = vunpack.i.h.bf16 %v3972_v29 }
 0x48d   : > { %v2982_v0 = vpack.c.bf16 %v1698_v60, %v1684_v46  ;;  %v3236_v49 = vpop.permute.xlu1 %3235  ;;  %v3226_v2 = vpop.permute.xlu0 %3225  ;;  %v2949_v6 = vpack.c.bf16 %v1696_v58, %v1682_v36  ;;  %v2947_v22 = vpack.c.bf16 %v1697_v1, %v1683_v21  ;;  %v1712_v27 = vsel %vm1347_vm14, %v3223_v53, %v3183_v20 }
 0x48e   : > { %v3238_v10 = vunpack.i.h.bf16 %v3236_v49  ;;  %v3228_v54 = vunpack.i.h.bf16 %v3226_v2  ;;  %v3227_v13 = vunpack.i.l.bf16 %v3226_v2  ;;  %v3237_v56 = vunpack.i.l.bf16 %v3236_v49 }
 0x48f   : > { %2983 = vmatpush1.bf16.msra.mxu1 %v2982_v0  ;;  %2948 = vmatprep.subr.bf16.mxu0 %v2947_v22  ;;  %v1710_v31 = vsel %vm1347_vm14, %v3182_v19, %v3222_v63  ;;  %v1711_v20 = vsel %vm1347_vm14, %v3222_v63, %v3223_v53  ;;  %v3192_v41 = vunpack.i.l.bf16 %v3983_v59  ;;  %v1771_v3 = vsel %vm4317_vm3, %v3142_v14, %v3143_v55 }
 0x490   : > { %v1724_v25 = vsel %vm1377_vm15, %v3187_v45, %v3227_v13  ;;  %v1726_v26 = vsel %vm1377_vm15, %v3228_v54, %v3188_v44  ;;  %2984 = vmatprep.subr.bf16.mxu1 %v3509_v11  ;;  %v1740_v38 = vsel %vm1407_vm2, %v3238_v10, %v3193_v40  ;;  %2950 = vmatpush1.bf16.msra.mxu0 %v2949_v6  ;;  %v3147_v44 = vunpack.i.l.bf16 %v3972_v29 }
 0x491   : > { %v2985_v17 = vpack.c.bf16 %v1726_v26, %v1712_v27  ;;  %v4011_v12 = vpop.permute.xlu1 %3240  ;;  %v3231_v30 = vpop.permute.xlu0 %3230  ;;  %v2953_v33 = vpack.c.bf16 %v1724_v25, %v1710_v31  ;;  %v1725_v39 = vsel %vm1377_vm15, %v3227_v13, %v3228_v54  ;;  %v1739_v32 = vsel %vm1407_vm2, %v3237_v56, %v3238_v10 }
 0x492   : > { %v2951_v42 = vpack.c.bf16 %v1725_v39, %v1711_v20  ;;  %v2988_v45 = vpack.c.bf16 %v3874_v57, %v1740_v38  ;;  %v3233_v46 = vunpack.i.h.bf16 %v3231_v30  ;;  %v3232_v50 = vunpack.i.l.bf16 %v3231_v30 }
 0x493   : > { %2986 = vmatpush1.bf16.msra.mxu1 %v2985_v17  ;;  %v1772_v58 = vsel %vm4318_vm4, %v3143_v55, %v3148_v34  ;;  %v1738_v59 = vsel %vm1407_vm2, %v3192_v41, %v3237_v56  ;;  %v2955_v63 = vpack.c.bf16 %v3872_v47, %v1739_v32  ;;  %v3153_v29 = vunpack.i.h.bf16 %v3970_v18 }
 0x494   : > { %2987 = vmatprep.subr.bf16.mxu1 %v3509_v11  ;;  %2952 = vmatprep.subr.bf16.mxu0 %v2951_v42  ;;  %v3152_v0 = vunpack.i.l.bf16 %v3970_v18  ;;  %v3243_v49 = vunpack.i.h.bf16 %v4011_v12  ;;  %v2959_v2 = vpack.c.bf16 %v1771_v3, %v3936_v51  ;;  %v1770_v28 = vsel %vm4319_vm12, %v3147_v44, %v3142_v14 }
 0x495   : > { %v3251_v36 = vpop.permute.xlu1 %3250  ;;  %v3246_v53 = vpop.permute.xlu0 %3245  ;;  %2954 = vmatpush1.bf16.msra.mxu0 %v2953_v33  ;;  %v2991_v55 = vpack.c.bf16 %v1772_v58, %v3942_v24  ;;  %v2957_v21 = vpack.c.bf16 %v3882_v61, %v1738_v59  ;;  %v1799_v10 = vsel %vm1287_vm7, %v3232_v50, %v3233_v46  ;;  %v3242_v56 = vunpack.i.l.bf16 %v4011_v12 }
 0x496   : > { %v3248_v60 = vunpack.i.h.bf16 %v3246_v53  ;;  %2956 = vmatprep.subr.bf16.mxu0 %v2955_v63  ;;  %v3247_v54 = vunpack.i.l.bf16 %v3246_v53  ;;  %v3253_v51 = vunpack.i.h.bf16 %v3251_v36  ;;  %v3252_v22 = vunpack.i.l.bf16 %v3251_v36 }
 0x497   : > { %2989 = vmatpush1.bf16.msra.mxu1 %v2988_v45  ;;  %v1786_v14 = vsel %vm1257_vm6, %v3153_v29, %v3243_v49  ;;  %v1785_v40 = vsel %vm1257_vm6, %v3152_v0, %v3153_v29  ;;  %v2961_v27 = vpack.c.bf16 %v1770_v28, %v3939_v23  ;;  %v1784_v20 = vsel %vm1257_vm6, %v3242_v56, %v3152_v0  ;;  %v4066_v56 = vld [vmem:[#allocation5] sm:$0xff] }
 0x498   : > { %2990 = vmatprep.subr.bf16.mxu1 %v3509_v11  ;;  %v1800_v18 = vsel %vm1287_vm7, %v3233_v46, %v3248_v60  ;;  %v2963_v34 = vpack.c.bf16 %v1799_v10, %v1785_v40  ;;  %v1798_v12 = vsel %vm1287_vm7, %v3247_v54, %v3232_v50  ;;  %v1813_v41 = vsel %vm1317_vm0, %v3252_v22, %v3253_v51 }
 0x499   : > { %v3261_v1 = vpop.permute.xlu1 %3260  ;;  %v3256_v6 = vpop.permute.xlu0 %3255  ;;  %2958 = vmatpush1.bf16.msra.mxu0 %v2957_v21  ;;  %v2994_v25 = vpack.c.bf16 %v1800_v18, %v1786_v14  ;;  %v2965_v44 = vpack.c.bf16 %v1798_v12, %v1784_v20  ;;  %vm2237_vm3 = vcmask 588800  }
 0x49a   : > { %v3258_v13 = vunpack.i.h.bf16 %v3256_v6  ;;  %v3257_v19 = vunpack.i.l.bf16 %v3256_v6  ;;  %v3263_v24 = vunpack.i.h.bf16 %v3261_v1  ;;  %2960 = vmatprep.subr.bf16.mxu0 %v2959_v2  ;;  %v3262_v26 = vunpack.i.l.bf16 %v3261_v1 }
 0x49b   : > { %2992 = vmatpush1.bf16.msra.mxu1 %v2991_v55 }
 0x49c   : > { %2993 = vmatprep.subr.bf16.mxu1 %v3509_v11  ;;  %v1827_v33 = vsel %vm1347_vm14, %v3257_v19, %v3258_v13  ;;  %v1814_v23 = vsel %vm1317_vm0, %v3253_v51, %v3263_v24  ;;  %v1812_v45 = vsel %vm1317_vm0, %v3262_v26, %v3252_v22 }
 0x49d   : > { %v3271_v17 = vpop.permute.xlu1 %3270  ;;  %v3266_v30 = vpop.permute.xlu0 %3265  ;;  %2962 = vmatpush1.bf16.msra.mxu0 %v2961_v27  ;;  %v2967_v36 = vpack.c.bf16 %v1827_v33, %v1813_v41 }
 0x49e   : > { %v3268_v31 = vunpack.i.h.bf16 %v3266_v30  ;;  %v3267_v38 = vunpack.i.l.bf16 %v3266_v30  ;;  %v3273_v39 = vunpack.i.h.bf16 %v3271_v17  ;;  %v3272_v32 = vunpack.i.l.bf16 %v3271_v17  ;;  %2964 = vmatprep.subr.bf16.mxu0 %v2963_v34 }
 0x49f   : > { %2995 = vmatpush1.bf16.msra.mxu1 %v2994_v25 }
 0x4a0   : > { %v1826_v42 = vsel %vm1347_vm14, %v3267_v38, %v3257_v19  ;;  %v1828_v3 = vsel %vm1347_vm14, %v3258_v13, %v3268_v31  ;;  %2996 = vmatprep.subr.bf16.mxu1 %v3509_v11  ;;  %v1849_v0 = vsel %vm1377_vm15, %v3272_v32, %v3273_v39  ;;  %v1860_v19 = vld [vmem:[%s4279_s5] sm:$0xff] }
 0x4a1   : > { %v2997_v46 = vpack.c.bf16 %v1828_v3, %v1814_v23  ;;  %v3281_v50 = vpop.permute.xlu1 %3280  ;;  %v3276_v53 = vpop.permute.xlu0 %3275  ;;  %v2969_v29 = vpack.c.bf16 %v1826_v42, %v1812_v45  ;;  %2966 = vmatpush1.bf16.msra.mxu0 %v2965_v44 }
 0x4a2   : > { %v3283_v58 = vunpack.i.h.bf16 %v3281_v50  ;;  %v3282_v59 = vunpack.i.l.bf16 %v3281_v50  ;;  %v3278_v60 = vunpack.i.h.bf16 %v3276_v53  ;;  %v3277_v63 = vunpack.i.l.bf16 %v3276_v53  ;;  %2968 = vmatprep.subr.bf16.mxu0 %v2967_v36 }
 0x4a3   : > { %2998 = vmatpush1.bf16.msra.mxu1 %v2997_v46 }
 0x4a4   : > { %v1848_v49 = vsel %vm1377_vm15, %v3282_v59, %v3272_v32  ;;  %v1851_v2 = vsel %vm1377_vm15, %v3283_v58, %v3277_v63  ;;  %v1852_v28 = vsel %vm1377_vm15, %v3277_v63, %v3278_v60  ;;  %2999 = vmatprep.subr.bf16.mxu1 %v3509_v11 }
 0x4a5   : > { %v3286_v55 = vpop.permute.xlu0 %3285  ;;  %v2971_v21 = vpack.c.bf16 %v1852_v28, %v1849_v0  ;;  %v2973_v10 = vpack.c.bf16 %v1851_v2, %v1848_v49  ;;  %2970 = vmatpush1.bf16.msra.mxu0 %v2969_v29 }
 0x4a6   : > { %v3288_v1 = vunpack.i.h.bf16 %v3286_v55  ;;  %v3287_v6 = vunpack.i.l.bf16 %v3286_v55 }
 0x4a7   : > { %2972 = vmatprep.subr.bf16.mxu0 %v2971_v21 }
 0x4a8   : > { %v1853_v54 = vsel %vm1377_vm15, %v3278_v60, %v3288_v1  ;;  %v1850_v18 = vsel %vm1377_vm15, %v3273_v39, %v3287_v6 }
 0x4a9   : > { %v3000_v13 = vpack.c.bf16 %v1853_v54, %v1850_v18  ;;  %2974 = vmatpush1.bf16.msra.mxu0 %v2973_v10 }
 0x4ab   : > { %3001 = vmatpush1.bf16.msra.mxu1 %v3000_v13 }
 0x4ac   : > { %3018 = vmatprep.subr.bf16.mxu1 %v3509_v11  ;;  %1936 = vmatmul.mubr.f32.vlgmr.msra.gmra.mrb[10].mxu0 %v1860_v19 }
 0x4ad   : > { %2305 = vmatprep.mubr.f32.mxu0 %v4066_v56 }
 0x4ae   : > { %2007 = vmatmul.mubr.f32.vlgmr.msra.gmra.mrb[10].mxu1 %v1860_v19 }
 0x4af   : > { %2915 = vmatprep.mubr.msk.f32.mxu1 %vm4320_vm1, %v4066_v56 }
 0x4b2   : > { %v1866_v51 = vpop.permute.xlu1 %1865 }
 0x4b6   : > { %v2017_v17 = vpop.permute.xlu0 %2016 }
 0x4b7   : > { %v2044_v59 = vpop.permute.xlu1 %2043 }
 0x57f   : > { %v1937_v22 = vpop.f32.mrb[10].mxu0 }
 0x580   : > { %v1938_v24 = vadd.f32 %v1937_v22, %v1866_v51  ;;  %v1939_v40 = vpop.f32.mrb[11].mxu0 }
 0x581   : > { %v2008_v14 = vpop.f32.mrb[10].mxu1  ;;  %v1940_v26 = vadd.f32 %v1939_v40, %v1866_v51 }
 0x582   : > { %v2009_v27 = vadd.f32 %v2008_v14, %v1866_v51  ;;  %v2010_v25 = vpop.f32.mrb[11].mxu1  ;;  %v2012_v30 = vmax.f32 %v1938_v24, 0.0 }
 0x583   : > { %v2013_v12 = vmax.f32 %v1940_v26, 0.0 }
 0x584   : > { %v2014_v34 = vmax.f32 %v2009_v27, 0.0  ;;  %v2019_v31 = vmul.f32 %v2017_v17, %v2012_v30 }
 0x585   : > { %v2020_v33 = vmul.f32 %v2017_v17, %v2013_v12 }
 0x586   : > { %v2021_v38 = vmul.f32 %v2017_v17, %v2014_v34  ;;  %v2022_v20 = vrot.slane %v2019_v31, 4 }
 0x587   : > { %v2028_v32 = vrot.slane %v2020_v33, 4 }
 0x588   : > { %v2034_v39 = vrot.slane %v2021_v38, 4  ;;  %v2023_v41 = vadd.f32 %v2022_v20, %v2019_v31 }
 0x589   : > { %v2029_v42 = vadd.f32 %v2028_v32, %v2020_v33 }
 0x58a   : > { %v2035_v23 = vadd.f32 %v2034_v39, %v2021_v38  ;;  %v2024_v3 = vrot.slane %v2023_v41, 2 }
 0x58b   : > { %v2030_v45 = vrot.slane %v2029_v42, 2 }
 0x58c   : > { %v2036_v44 = vrot.slane %v2035_v23, 2  ;;  %v2025_v46 = vadd.f32 %v2024_v3, %v2023_v41 }
 0x58d   : > { %v2031_v36 = vadd.f32 %v2030_v45, %v2029_v42 }
 0x58e   : > { %v2037_v50 = vadd.f32 %v2036_v44, %v2035_v23  ;;  %v2026_v53 = vrot.slane %v2025_v46, 1 }
 0x58f   : > { %v2032_v60 = vrot.slane %v2031_v36, 1 }
 0x590   : > { %v2038_v58 = vrot.slane %v2037_v50, 1  ;;  %v2027_v63 = vadd.f32 %v2026_v53, %v2025_v46 }
 0x591   : > { %v2033_v0 = vadd.f32 %v2032_v60, %v2031_v36 }
 0x592   : > { %v2039_v29 = vadd.f32 %v2038_v58, %v2037_v50  ;;  %v2046_v49 = vadd.f32 %v2044_v59, %v2027_v63 }
 0x593   : > { %v2047_v28 = vadd.f32 %v2044_v59, %v2033_v0 }
 0x594   : > { %v2048_v2 = vadd.f32 %v2044_v59, %v2039_v29  ;;  %v2804_v55 = vmul.f32 -1.442695, %v2046_v49 }
 0x595   : > { %v2805_v1 = vmul.f32 -1.442695, %v2047_v28 }
 0x596   : > { %v2806_v21 = vmul.f32 -1.442695, %v2048_v2  ;;  %3438 = vpow2.f32 %v2804_v55 }
 0x597   : > { %3440 = vpow2.f32 %v2805_v1 }
 0x598   : > { %3442 = vpow2.f32 %v2806_v21 }
 0x5a0   : > { %v3439_v6 = vpop.eup %3438 }
 0x5a1   : > { %v3441_v10 = vpop.eup %3440  ;;  %v2058_v54 = vadd.f32 1.0, %v3439_v6 }
 0x5a2   : > { %v3443_v18 = vpop.eup %3442  ;;  %v2059_v13 = vadd.f32 1.0, %v3441_v10 }
 0x5a3   : > { %v2060_v19 = vadd.f32 1.0, %v3443_v18  ;;  %3444 = vrcp.f32 %v2058_v54 }
 0x5a4   : > { %3446 = vrcp.f32 %v2059_v13 }
 0x5a5   : > { %3448 = vrcp.f32 %v2060_v19 }
 0x5ad   : > { %v3445_v51 = vpop.eup %3444 }
 0x5ae   : > { %v3447_v22 = vpop.eup %3446  ;;  %v2070_v14 = vrot.slane %v3445_v51, %v3859_v37 }
 0x5af   : > { %v3449_v24 = vpop.eup %3448  ;;  %v2074_v40 = vrot.slane %v3447_v22, %v3859_v37 }
 0x5b0   : > { %2082 = vrot.lane.b32.xlu1 %v2070_v14, %s3508_s12  ;;  %v2078_v27 = vrot.slane %v3449_v24, %v3859_v37 }
 0x5b1   : > { %2084 = vrot.lane.b32.xlu0 %v2074_v40, %s3508_s12 }
 0x5b4   : > { %2086 = vrot.lane.b32.xlu1 %v2078_v27, %s3508_s12 }
 0x622   : > { %v2083_v25 = vpop.permute.xlu1 %2082 }
 0x623   : > { %v2094_v26 = vmul.f32 %v2083_v25, %v3882_v61  ;;  %v2085_v17 = vpop.permute.xlu0 %2084 }
 0x624   : > { %v2088_v30 = vsel %vm1608_vm10, %v2083_v25, %v2085_v17 }
 0x625   : > { %v2098_v34 = vadd.f32 %v2094_v26, %v3904_v8  ;;  %v2095_v12 = vmul.f32 %v2088_v30, %v3872_v47 }
 0x626   : > { %v2087_v31 = vpop.permute.xlu1 %2086 }
 0x627   : > { %2106 = vst.msk [vmem:[#allocation5] sm:$0xff] %vm1615_vm9, %v2098_v34  ;;  %v4083_v38 = vadd.f32 %v2095_v12, %v3898_v52  ;;  %v2089_v37 = vsel %vm1608_vm10, %v2085_v17, %v2087_v31  ;;  %v2097_v33 = vmul.f32 %v2087_v31, %v3884_v62  ;;  %v4122_v62 = vld [vmem:[%s4282_s8] sm:$0xff] }
 0x628   : > { %v2096_v20 = vmul.f32 %v2089_v37, %v3874_v57 }
 0x629   : > { %v2101_v61 = vadd.f32 %v2097_v33, %v3906_v9 }
 0x62a   : > { %v4090_v39 = vadd.f32 %v2096_v20, %v3901_v7 }
 0x62b   : > { %2109 = vst.msk [vmem:[#allocation5 + $0x18] sm:$0xff] %vm1608_vm10, %v2101_v61 }
 0x62c   : > { %v3326_v57 = vpack.i.bf16 %v4090_v39, %v4083_v38 }
 0x62e   : > { %v4093_v47 = vld [vmem:[#allocation5] sm:$0xff] }
 0x632   : > { %v2113_v8 = vld [vmem:[#allocation5 + $0x18] sm:$0xff] }
 0x633   : > { %v3296_v32 = vpack.i.bf16 %v2113_v8, %v4093_v47 }
 0x635   : > { %3297 = vrot.lane.b32.xlu0 %v3296_v32, %s3480_s26  ;;  %3292 = vrot.lane.b32.xlu1 %v3296_v32, %s3492_s13 }
 0x639   : > { %3307 = vrot.lane.b32.xlu0 %v3296_v32, %s3493_s14  ;;  %3302 = vrot.lane.b32.xlu1 %v3296_v32, %s3476_s22 }
 0x63d   : > { %3317 = vrot.lane.b32.xlu0 %v3296_v32, %s3474_s20  ;;  %3312 = vrot.lane.b32.xlu1 %v3296_v32, %s4312_s24 }
 0x641   : > { %3322 = vrot.lane.b32.xlu1 %v3296_v32, %s4313_s29  ;;  %3327 = vrot.lane.b32.xlu0 %v3326_v57, %s3492_s13 }
 0x645   : > { %3337 = vrot.lane.b32.xlu1 %v3326_v57, %s3476_s22  ;;  %3332 = vrot.lane.b32.xlu0 %v3326_v57, %s3480_s26 }
 0x649   : > { %3347 = vrot.lane.b32.xlu1 %v3326_v57, %s4312_s24  ;;  %3342 = vrot.lane.b32.xlu0 %v3326_v57, %s3493_s14 }
 0x64d   : > { %3357 = vrot.lane.b32.xlu1 %v3326_v57, %s4313_s29  ;;  %3352 = vrot.lane.b32.xlu0 %v3326_v57, %s3474_s20 }
 0x651   : > { %2220 = vrot.lane.b32.xlu1 %v4090_v39, %s3481_s27  ;;  %2218 = vrot.lane.b32.xlu0 %v4083_v38, %s3481_s27 }
 0x655   : > { %2222 = vrot.lane.b32.xlu1 %v2113_v8, %s3481_s27  ;;  %2216 = vrot.lane.b32.xlu0 %v4093_v47, %s3481_s27 }
 0x659   : > { %2234 = vperm.xlu0 %3361, %v4122_v62   ;;  %2386 = vperm.xlu1 %3362, %v4122_v62  }
 0x65d   : > { %3363 = vset.pattern.permute.xlu1 %v3464_v4  ;;  %3435 = vset.pattern.permute.xlu0 %v3473_v16 }
 0x65e   : > { %2393 = vperm.xlu1 %3363, %v4122_v62  }
 0x662   : > { %3434 = vset.pattern.permute.xlu1 %v3472_v15 }
 0x6a7   : > { %v3298_v52 = vpop.permute.xlu0 %3297  ;;  %v3293_v7 = vpop.permute.xlu1 %3292 }
 0x6a8   : > { %v3295_v45 = vunpack.i.h.bf16 %v3293_v7  ;;  %v3294_v46 = vunpack.i.l.bf16 %v3293_v7  ;;  %v3300_v36 = vunpack.i.h.bf16 %v3298_v52  ;;  %v3299_v16 = vunpack.i.l.bf16 %v3298_v52 }
 0x6ab   : > { %v3308_v9 = vpop.permute.xlu0 %3307  ;;  %v3303_v41 = vpop.permute.xlu1 %3302 }
 0x6ac   : > { %v3310_v53 = vunpack.i.h.bf16 %v3308_v9  ;;  %v3305_v58 = vunpack.i.h.bf16 %v3303_v41  ;;  %v3304_v63 = vunpack.i.l.bf16 %v3303_v41  ;;  %v3309_v10 = vunpack.i.l.bf16 %v3308_v9 }
 0x6af   : > { %v4130_v23 = vpop.permute.xlu0 %3317  ;;  %v3313_v42 = vpop.permute.xlu1 %3312 }
 0x6b0   : > { %v3320_v54 = vunpack.i.h.bf16 %v4130_v23  ;;  %v3315_v18 = vunpack.i.h.bf16 %v3313_v42  ;;  %v3314_v13 = vunpack.i.l.bf16 %v3313_v42 }
 0x6b3   : > { %v4132_v3 = vpop.permute.xlu1 %3322  ;;  %v3328_v44 = vpop.permute.xlu0 %3327 }
 0x6b4   : > { %v3330_v50 = vunpack.i.h.bf16 %v3328_v44  ;;  %v3329_v4 = vunpack.i.l.bf16 %v3328_v44  ;;  %v3325_v37 = vunpack.i.h.bf16 %v4132_v3  ;;  %v3324_v33 = vunpack.i.l.bf16 %v4132_v3 }
 0x6b6   : > { %v2128_v15 = vsel %vm1197_vm8, %v3330_v50, %v3295_v45  ;;  %v2126_v59 = vsel %vm1197_vm8, %v3294_v46, %v3329_v4  ;;  %v2127_v60 = vsel %vm1197_vm8, %v3329_v4, %v3330_v50 }
 0x6b7   : > { %v3019_v29 = vpack.c.bf16 %v2128_v15, %v4090_v39  ;;  %v3004_v0 = vpack.c.bf16 %v2126_v59, %v4093_v47  ;;  %v3338_v49 = vpop.permute.xlu1 %3337  ;;  %v3333_v2 = vpop.permute.xlu0 %3332  ;;  %v3002_v28 = vpack.c.bf16 %v2127_v60, %v4083_v38  ;;  %v3319_v38 = vunpack.i.l.bf16 %v4130_v23 }
 0x6b8   : > { %v3340_v55 = vunpack.i.h.bf16 %v3338_v49  ;;  %v3339_v21 = vunpack.i.l.bf16 %v3338_v49  ;;  %v3335_v1 = vunpack.i.h.bf16 %v3333_v2  ;;  %v3334_v6 = vunpack.i.l.bf16 %v3333_v2  ;;  %v2230_v49 = vld [vmem:[%s4281_s7] sm:$0xff] }
 0x6b9   : > { %3003 = vmatprep.subr.bf16.mxu0 %v3002_v28  ;;  %3020 = vmatpush3.bf16.msra.mxu1 %v3019_v29 }
 0x6ba   : > { %v2156_v19 = vsel %vm1257_vm6, %v3340_v55, %v3305_v58  ;;  %v2154_v51 = vsel %vm1257_vm6, %v3304_v63, %v3339_v21  ;;  %v2142_v22 = vsel %vm4321_vm5, %v3335_v1, %v3300_v36  ;;  %v2140_v14 = vsel %vm4322_vm11, %v3299_v16, %v3334_v6  ;;  %3005 = vmatpush1.bf16.msra.mxu0 %v3004_v0 }
 0x6bb   : > { %v3022_v24 = vpack.c.bf16 %v2156_v19, %v2142_v22  ;;  %v3008_v40 = vpack.c.bf16 %v2154_v51, %v2140_v14  ;;  %v3348_v27 = vpop.permute.xlu1 %3347  ;;  %v3343_v25 = vpop.permute.xlu0 %3342  ;;  %3021 = vmatprep.subr.bf16.mxu1 %v3509_v11  ;;  %v2141_v26 = vsel %vm4323_vm13, %v3334_v6, %v3335_v1  ;;  %v2155_v17 = vsel %vm1257_vm6, %v3339_v21, %v3340_v55 }
 0x6bc   : > { %v3350_v30 = vunpack.i.h.bf16 %v3348_v27  ;;  %v3349_v34 = vunpack.i.l.bf16 %v3348_v27  ;;  %v3345_v12 = vunpack.i.h.bf16 %v3343_v25  ;;  %v3344_v31 = vunpack.i.l.bf16 %v3343_v25 }
 0x6bd   : > { %v3006_v20 = vpack.c.bf16 %v2155_v17, %v2141_v26  ;;  %3023 = vmatpush3.bf16.msra.mxu1 %v3022_v24 }
 0x6be   : > { %v2184_v61 = vsel %vm1317_vm0, %v3350_v30, %v3315_v18  ;;  %v2182_v39 = vsel %vm1317_vm0, %v3314_v13, %v3349_v34  ;;  %v2170_v47 = vsel %vm1287_vm7, %v3345_v12, %v3310_v53  ;;  %v2168_v8 = vsel %vm1287_vm7, %v3309_v10, %v3344_v31  ;;  %3024 = vmatprep.subr.bf16.mxu1 %v3509_v11 }
 0x6bf   : > { %v3025_v32 = vpack.c.bf16 %v2184_v61, %v2170_v47  ;;  %v3012_v57 = vpack.c.bf16 %v2182_v39, %v2168_v8  ;;  %3007 = vmatprep.subr.bf16.mxu0 %v3006_v20  ;;  %v3358_v52 = vpop.permute.xlu1 %3357  ;;  %v3353_v7 = vpop.permute.xlu0 %3352  ;;  %v2169_v9 = vsel %vm1287_vm7, %v3344_v31, %v3345_v12  ;;  %v2183_v41 = vsel %vm1317_vm0, %v3349_v34, %v3350_v30 }
 0x6c0   : > { %3009 = vmatpush1.bf16.msra.mxu0 %v3008_v40  ;;  %v3360_v23 = vunpack.i.h.bf16 %v3358_v52  ;;  %v3359_v42 = vunpack.i.l.bf16 %v3358_v52  ;;  %v3355_v3 = vunpack.i.h.bf16 %v3353_v7  ;;  %v3354_v44 = vunpack.i.l.bf16 %v3353_v7 }
 0x6c1   : > { %v3010_v45 = vpack.c.bf16 %v2183_v41, %v2169_v9  ;;  %3026 = vmatpush3.bf16.msra.mxu1 %v3025_v32 }
 0x6c2   : > { %v2212_v46 = vsel %vm1377_vm15, %v3360_v23, %v3325_v37  ;;  %v2210_v50 = vsel %vm1377_vm15, %v3324_v33, %v3359_v42  ;;  %v2198_v4 = vsel %vm1347_vm14, %v3355_v3, %v3320_v54  ;;  %v2196_v36 = vsel %vm1347_vm14, %v3319_v38, %v3354_v44  ;;  %3027 = vmatprep.subr.bf16.mxu1 %v3509_v11 }
 0x6c3   : > { %v3028_v16 = vpack.c.bf16 %v2212_v46, %v2198_v4  ;;  %3011 = vmatprep.subr.bf16.mxu0 %v3010_v45  ;;  %v2221_v53 = vpop.permute.xlu1 %2220  ;;  %v2219_v58 = vpop.permute.xlu0 %2218  ;;  %v2197_v15 = vsel %vm1347_vm14, %v3354_v44, %v3355_v3  ;;  %v2211_v59 = vsel %vm1377_vm15, %v3359_v42, %v3360_v23  ;;  %v3016_v60 = vpack.c.bf16 %v2210_v50, %v2196_v36 }
 0x6c4   : > { %3013 = vmatpush1.bf16.msra.mxu0 %v3012_v57  ;;  %v3014_v63 = vpack.c.bf16 %v2211_v59, %v2197_v15  ;;  %v2225_v28 = vsel %vm1407_vm2, %v2219_v58, %v2221_v53 }
 0x6c5   : > { %3029 = vmatpush3.bf16.msra.mxu1 %v3028_v16 }
 0x6c6   : > { %3015 = vmatprep.subr.bf16.mxu0 %v3014_v63  ;;  %2913 = vmatprep.subr.mxu1 %v4066_v56 }
 0x6c7   : > { %v2223_v29 = vpop.permute.xlu1 %2222  ;;  %v2217_v0 = vpop.permute.xlu0 %2216 }
 0x6c8   : > { %3017 = vmatpush1.bf16.msra.mxu0 %v3016_v60  ;;  %v2226_v2 = vsel %vm1407_vm2, %v2221_v53, %v2223_v29  ;;  %v2224_v55 = vsel %vm1407_vm2, %v2217_v0, %v2219_v58 }
 0x6c9   : > { %2257 = vmatprep.subr.mxu0 %v2225_v28  ;;  %2914 = vmatpush3.msra.mxu1 %v2226_v2 }
 0x6ca   : > { %2916 = vmatmul.mubr.msk.f32.vlgmr.msra.gmra.mrb[12].mxu1 %vm2237_vm3, %v2230_v49  ;;  %3046 = vmatprep.subr.bf16.mxu1 %v3509_v11 }
 0x6cb   : > { %2936 = vmatprep.mubr.msk.f32.mxu1 %vm4320_vm1, %v4066_v56 }
 0x6cc   : > { %2258 = vmatpush1.msra.mxu0 %v2224_v55 }
 0x6cd   : > { %2807 = vmatmul.mubr.msk.f32.vlgmr.msra.gmra.mrb[12].mxu0 %vm2237_vm3, %v2230_v49 }
 0x6ce   : > { %2619 = vmatprep.mubr.f32.mxu0 %v4066_v56 }
 0x6d8   : > { %v2235_v21 = vpop.permute.xlu0 %2234  ;;  %v2387_v10 = vpop.permute.xlu1 %2386 }
 0x6dd   : > { %v2394_v40 = vpop.permute.xlu1 %2393 }
 0x79d   : > { %v2378_v1 = vpop.f32.mrb[12].mxu1 }
 0x79e   : > { %v2379_v6 = vadd.f32 %v2378_v1, %v2235_v21  ;;  %v2917_v54 = vpop.f32.mrb[13].mxu1 }
 0x7a0   : > { %v2307_v18 = vpop.f32.mrb[12].mxu0  ;;  %v2384_v19 = vmax.f32 %v2379_v6, 0.0 }
 0x7a1   : > { %v2308_v13 = vadd.f32 %v2307_v18, %v2235_v21  ;;  %v2309_v51 = vpop.f32.mrb[13].mxu0 }
 0x7a2   : > { %v2310_v22 = vadd.f32 %v2309_v51, %v2235_v21  ;;  %v2391_v25 = vmul.f32 %v2387_v10, %v2384_v19 }
 0x7a3   : > { %v2382_v14 = vmax.f32 %v2308_v13, 0.0 }
 0x7a4   : > { %v2383_v24 = vmax.f32 %v2310_v22, 0.0  ;;  %v2398_v34 = vadd.f32 %v2394_v40, %v2391_v25 }
 0x7a5   : > { %v2389_v27 = vmul.f32 %v2387_v10, %v2382_v14 }
 0x7a6   : > { %v2390_v26 = vmul.f32 %v2387_v10, %v2383_v24  ;;  %v2401_v38 = vmul.f32 %v2398_v34, %v3869_v48 }
 0x7a7   : > { %v2396_v17 = vadd.f32 %v2394_v40, %v2389_v27 }
 0x7a8   : > { %v2397_v30 = vadd.f32 %v2394_v40, %v2390_v26 }
 0x7a9   : > { %v2399_v12 = vmul.f32 %v2396_v17, %v3865_v5 }
 0x7aa   : > { %v2400_v31 = vmul.f32 %v2397_v30, %v3867_v43 }
 0x7ab   : > { %2409 = vrot.lane.b32.xlu0 %v2399_v12, %s3508_s12 }
 0x7ac   : > { %2411 = vrot.lane.b32.xlu1 %v2400_v31, %s3508_s12 }
 0x7af   : > { %2413 = vrot.lane.b32.xlu0 %v2401_v38, %s3508_s12 }
 0x81d   : > { %v2410_v37 = vpop.permute.xlu0 %2409 }
 0x81e   : > { %2421 = vst.msk [vmem:[#allocation6] sm:$0xff] %vm1615_vm9, %v2410_v37  ;;  %v2412_v33 = vpop.permute.xlu1 %2411  ;;  %vm4325_vm9 = vmmov %vm4318_vm4 }
 0x81f   : > { %v4186_v20 = vsel %vm1608_vm10, %v2410_v37, %v2412_v33 }
 0x821   : > { %v2414_v61 = vpop.permute.xlu0 %2413 }
 0x822   : > { %v4189_v5 = vsel %vm1608_vm10, %v2412_v33, %v2414_v61  ;;  %2424 = vst.msk [vmem:[#allocation6 + $0x18] sm:$0xff] %vm1608_vm10, %v2414_v61  ;;  %vm4326_vm10 = vmmov %vm4318_vm4 }
 0x823   : > { %v3399_v47 = vpack.i.bf16 %v4189_v5, %v4186_v20 }
 0x825   : > { %v4192_v43 = vld [vmem:[#allocation6] sm:$0xff] }
 0x829   : > { %v2428_v39 = vld [vmem:[#allocation6 + $0x18] sm:$0xff] }
 0x82a   : > { %v3369_v48 = vpack.i.bf16 %v2428_v39, %v4192_v43 }
 0x82c   : > { %3370 = vrot.lane.b32.xlu1 %v3369_v48, %s3480_s26  ;;  %3365 = vrot.lane.b32.xlu0 %v3369_v48, %s3492_s13 }
 0x830   : > { %3380 = vrot.lane.b32.xlu1 %v3369_v48, %s3493_s14  ;;  %3375 = vrot.lane.b32.xlu0 %v3369_v48, %s3476_s22 }
 0x834   : > { %3390 = vrot.lane.b32.xlu1 %v3369_v48, %s3474_s20  ;;  %3385 = vrot.lane.b32.xlu0 %v3369_v48, %s4312_s24 }
 0x838   : > { %3395 = vrot.lane.b32.xlu0 %v3369_v48, %s4313_s29  ;;  %3400 = vrot.lane.b32.xlu1 %v3399_v47, %s3492_s13 }
 0x83c   : > { %3410 = vrot.lane.b32.xlu0 %v3399_v47, %s3476_s22  ;;  %3405 = vrot.lane.b32.xlu1 %v3399_v47, %s3480_s26  ;;  %s3058_s26 = smul.u32 24, %s4328_s18 }
 0x840   : > { %3420 = vrot.lane.b32.xlu0 %v3399_v47, %s4312_s24  ;;  %3415 = vrot.lane.b32.xlu1 %v3399_v47, %s3493_s14  ;;  %s403_s14 = scalar_lea.vmem %s4285_s11, %s3058_s26 }
 0x844   : > { %3430 = vrot.lane.b32.xlu0 %v3399_v47, %s4313_s29  ;;  %3425 = vrot.lane.b32.xlu1 %v3399_v47, %s3474_s20 }
 0x848   : > { %2535 = vrot.lane.b32.xlu0 %v4189_v5, %s3481_s27  ;;  %2533 = vrot.lane.b32.xlu1 %v4186_v20, %s3481_s27 }
 0x84c   : > { %2537 = vrot.lane.b32.xlu0 %v2428_v39, %s3481_s27  ;;  %2531 = vrot.lane.b32.xlu1 %v4192_v43, %s3481_s27 }
 0x850   : > { %2549 = vperm.xlu1 %3434, %v4122_v62   ;;  %2700 = vperm.xlu0 %3435, %v4122_v62  }
 0x854   : > { %3436 = vset.pattern.permute.xlu1 %v3486_v35  ;;  %3437 = vset.pattern.permute.xlu0 %v3486_v35 }
 0x855   : > { %2707 = vperm.xlu1 %3436, %v4122_v62  }
 0x89e   : > { %v3371_v8 = vpop.permute.xlu1 %3370  ;;  %v3366_v32 = vpop.permute.xlu0 %3365 }
 0x89f   : > { %v3368_v42 = vunpack.i.h.bf16 %v3366_v32  ;;  %v3367_v3 = vunpack.i.l.bf16 %v3366_v32  ;;  %v3373_v46 = vunpack.i.h.bf16 %v3371_v8  ;;  %v3372_v50 = vunpack.i.l.bf16 %v3371_v8 }
 0x8a2   : > { %v3381_v57 = vpop.permute.xlu1 %3380  ;;  %v3376_v52 = vpop.permute.xlu0 %3375 }
 0x8a3   : > { %v3383_v4 = vunpack.i.h.bf16 %v3381_v57  ;;  %v3378_v35 = vunpack.i.h.bf16 %v3376_v52  ;;  %v3377_v53 = vunpack.i.l.bf16 %v3376_v52  ;;  %v3382_v28 = vunpack.i.l.bf16 %v3381_v57 }
 0x8a6   : > { %v4223_v7 = vpop.permute.xlu1 %3390  ;;  %v3386_v9 = vpop.permute.xlu0 %3385 }
 0x8a7   : > { %v3393_v55 = vunpack.i.h.bf16 %v4223_v7  ;;  %v3388_v21 = vunpack.i.h.bf16 %v3386_v9  ;;  %v3387_v1 = vunpack.i.l.bf16 %v3386_v9  ;;  %v3392_v17 = vunpack.i.l.bf16 %v4223_v7 }
 0x8aa   : > { %v4225_v41 = vpop.permute.xlu0 %3395  ;;  %v3401_v23 = vpop.permute.xlu1 %3400 }
 0x8ab   : > { %v3403_v44 = vunpack.i.h.bf16 %v3401_v23  ;;  %v3402_v45 = vunpack.i.l.bf16 %v3401_v23  ;;  %v3398_v30 = vunpack.i.h.bf16 %v4225_v41  ;;  %v3397_v34 = vunpack.i.l.bf16 %v4225_v41 }
 0x8ad   : > { %v2443_v62 = vsel %vm1197_vm8, %v3403_v44, %v3368_v42  ;;  %v2441_v36 = vsel %vm1197_vm8, %v3367_v3, %v3402_v45  ;;  %v2442_v16 = vsel %vm1197_vm8, %v3402_v45, %v3403_v44  ;;  %vm4324_vm8 = vmmov %vm4318_vm4 }
 0x8ae   : > { %v3047_v58 = vpack.c.bf16 %v2443_v62, %v4189_v5  ;;  %v3032_v15 = vpack.c.bf16 %v2441_v36, %v4192_v43  ;;  %v3411_v59 = vpop.permute.xlu0 %3410  ;;  %v3406_v60 = vpop.permute.xlu1 %3405  ;;  %v3030_v63 = vpack.c.bf16 %v2442_v16, %v4186_v20 }
 0x8af   : > { %v3413_v29 = vunpack.i.h.bf16 %v3411_v59  ;;  %v3412_v0 = vunpack.i.l.bf16 %v3411_v59  ;;  %v3408_v49 = vunpack.i.h.bf16 %v3406_v60  ;;  %v3407_v2 = vunpack.i.l.bf16 %v3406_v60 }
 0x8b0   : > { %3031 = vmatprep.subr.bf16.mxu0 %v3030_v63  ;;  %3048 = vmatpush3.bf16.msra.mxu1 %v3047_v58 }
 0x8b1   : > { %v2471_v6 = vsel %vm1257_vm6, %v3413_v29, %v3378_v35  ;;  %v2469_v10 = vsel %vm1257_vm6, %v3377_v53, %v3412_v0  ;;  %v2457_v54 = vsel %vm4324_vm8, %v3408_v49, %v3373_v46  ;;  %v2455_v18 = vsel %vm4325_vm9, %v3372_v50, %v3407_v2  ;;  %3033 = vmatpush1.bf16.msra.mxu0 %v3032_v15 }
 0x8b2   : > { %v3050_v13 = vpack.c.bf16 %v2471_v6, %v2457_v54  ;;  %v3036_v19 = vpack.c.bf16 %v2469_v10, %v2455_v18  ;;  %v3421_v51 = vpop.permute.xlu0 %3420  ;;  %v3416_v22 = vpop.permute.xlu1 %3415  ;;  %3049 = vmatprep.subr.bf16.mxu1 %v3509_v11  ;;  %v2456_v14 = vsel %vm4326_vm10, %v3407_v2, %v3408_v49  ;;  %v2470_v24 = vsel %vm1257_vm6, %v3412_v0, %v3413_v29 }
 0x8b3   : > { %v3423_v40 = vunpack.i.h.bf16 %v3421_v51  ;;  %v3422_v27 = vunpack.i.l.bf16 %v3421_v51  ;;  %v3418_v25 = vunpack.i.h.bf16 %v3416_v22  ;;  %v3417_v26 = vunpack.i.l.bf16 %v3416_v22 }
 0x8b4   : > { %v3034_v12 = vpack.c.bf16 %v2470_v24, %v2456_v14  ;;  %3051 = vmatpush3.bf16.msra.mxu1 %v3050_v13 }
 0x8b5   : > { %v2499_v31 = vsel %vm1317_vm0, %v3423_v40, %v3388_v21  ;;  %v2497_v38 = vsel %vm1317_vm0, %v3387_v1, %v3422_v27  ;;  %v2485_v37 = vsel %vm1287_vm7, %v3418_v25, %v3383_v4  ;;  %v2483_v33 = vsel %vm1287_vm7, %v3382_v28, %v3417_v26  ;;  %3052 = vmatprep.subr.bf16.mxu1 %v3509_v11 }
 0x8b6   : > { %v3053_v20 = vpack.c.bf16 %v2499_v31, %v2485_v37  ;;  %v3040_v61 = vpack.c.bf16 %v2497_v38, %v2483_v33  ;;  %3035 = vmatprep.subr.bf16.mxu0 %v3034_v12  ;;  %v3431_v5 = vpop.permute.xlu0 %3430  ;;  %v3426_v43 = vpop.permute.xlu1 %3425  ;;  %v2484_v39 = vsel %vm1287_vm7, %v3417_v26, %v3418_v25  ;;  %v2498_v48 = vsel %vm1317_vm0, %v3422_v27, %v3423_v40 }
 0x8b7   : > { %3037 = vmatpush1.bf16.msra.mxu0 %v3036_v19  ;;  %v3433_v47 = vunpack.i.h.bf16 %v3431_v5  ;;  %v3432_v8 = vunpack.i.l.bf16 %v3431_v5  ;;  %v3428_v32 = vunpack.i.h.bf16 %v3426_v43  ;;  %v3427_v57 = vunpack.i.l.bf16 %v3426_v43 }
 0x8b8   : > { %v3038_v52 = vpack.c.bf16 %v2498_v48, %v2484_v39  ;;  %3054 = vmatpush3.bf16.msra.mxu1 %v3053_v20 }
 0x8b9   : > { %v2527_v7 = vsel %vm1377_vm15, %v3433_v47, %v3398_v30  ;;  %v2525_v9 = vsel %vm1377_vm15, %v3397_v34, %v3432_v8  ;;  %v2513_v41 = vsel %vm1347_vm14, %v3428_v32, %v3393_v55  ;;  %v2511_v23 = vsel %vm1347_vm14, %v3392_v17, %v3427_v57  ;;  %3055 = vmatprep.subr.bf16.mxu1 %v3509_v11  ;;  %v2545_v11 = vld [vmem:[%s4283_s9] sm:$0xff] }
 0x8ba   : > { %v3056_v42 = vpack.c.bf16 %v2527_v7, %v2513_v41  ;;  %3039 = vmatprep.subr.bf16.mxu0 %v3038_v52  ;;  %v2536_v3 = vpop.permute.xlu0 %2535  ;;  %v2534_v44 = vpop.permute.xlu1 %2533  ;;  %v2512_v45 = vsel %vm1347_vm14, %v3427_v57, %v3428_v32  ;;  %v2526_v46 = vsel %vm1377_vm15, %v3432_v8, %v3433_v47  ;;  %v3044_v50 = vpack.c.bf16 %v2525_v9, %v2511_v23 }
 0x8bb   : > { %3041 = vmatpush1.bf16.msra.mxu0 %v3040_v61  ;;  %v3042_v4 = vpack.c.bf16 %v2526_v46, %v2512_v45  ;;  %v2540_v16 = vsel %vm1407_vm2, %v2534_v44, %v2536_v3 }
 0x8bc   : > { %3057 = vmatpush3.bf16.msra.mxu1 %v3056_v42 }
 0x8bd   : > { %3043 = vmatprep.subr.bf16.mxu0 %v3042_v4  ;;  %2934 = vmatprep.subr.mxu1 %v4066_v56 }
 0x8be   : > { %v2538_v35 = vpop.permute.xlu0 %2537  ;;  %v2532_v62 = vpop.permute.xlu1 %2531 }
 0x8bf   : > { %3045 = vmatpush1.bf16.msra.mxu0 %v3044_v50  ;;  %v2541_v36 = vsel %vm1407_vm2, %v2536_v3, %v2538_v35  ;;  %v2539_v53 = vsel %vm1407_vm2, %v2532_v62, %v2534_v44 }
 0x8c0   : > { %2571 = vmatprep.subr.mxu0 %v2540_v16  ;;  %2935 = vmatpush3.msra.mxu1 %v2541_v36 }
 0x8c1   : > { %2937 = vmatmul.mubr.msk.f32.vlgmr.msra.gmra.mrb[14].mxu1 %vm2237_vm3, %v2545_v11 }
 0x8c3   : > { %2572 = vmatpush1.msra.mxu0 %v2539_v53 }
 0x8c4   : > { %2809 = vmatmul.mubr.msk.f32.vlgmr.msra.gmra.mrb[14].mxu0 %vm2237_vm3, %v2545_v11 }
 0x8cf   : > { %v2550_v56 = vpop.permute.xlu1 %2549  ;;  %v2701_v60 = vpop.permute.xlu0 %2700 }
 0x8d4   : > { %v2708_v2 = vpop.permute.xlu1 %2707 }
 0x994   : > { %v2692_v58 = vpop.f32.mrb[14].mxu1 }
 0x995   : > { %v2693_v15 = vadd.f32 %v2692_v58, %v2550_v56  ;;  %v2938_v59 = vpop.f32.mrb[15].mxu1 }
 0x997   : > { %v2621_v63 = vpop.f32.mrb[14].mxu0  ;;  %v2698_v29 = vmax.f32 %v2693_v15, 0.0 }
 0x998   : > { %v2622_v0 = vadd.f32 %v2621_v63, %v2550_v56  ;;  %v2623_v49 = vpop.f32.mrb[15].mxu0 }
 0x999   : > { %v2624_v28 = vadd.f32 %v2623_v49, %v2550_v56  ;;  %v2705_v55 = vmul.f32 %v2701_v60, %v2698_v29 }
 0x99a   : > { %v2696_v21 = vmax.f32 %v2622_v0, 0.0 }
 0x99b   : > { %v2697_v1 = vmax.f32 %v2624_v28, 0.0  ;;  %v2712_v6 = vadd.f32 %v2708_v2, %v2705_v55 }
 0x99c   : > { %v2703_v10 = vmul.f32 %v2701_v60, %v2696_v21 }
 0x99d   : > { %v2704_v54 = vmul.f32 %v2701_v60, %v2697_v1  ;;  %2715 = vst [vmem:[%s403_s14 + $0x10] sm:$0xff] %v2712_v6 }
 0x99e   : > { %v2710_v18 = vadd.f32 %v2708_v2, %v2703_v10 }
 0x99f   : > { %v2711_v13 = vadd.f32 %v2708_v2, %v2704_v54 }
 0x9a0   : > { %2713 = vst [vmem:[%s403_s14] sm:$0xff] %v2710_v18 }
 0x9a1   : > { %2714 = vst [vmem:[%s403_s14 + $0x8] sm:$0xff] %v2711_v13 }
 0x9a2 PF: > { %s21_s17 = sadd.s32 1, %s3457_s17  }
 0x9a3   : > { %p18_p4 = scmp.ge.s32.totalorder %s21_s17, 4  }
 0x9a5   :  { %20 = sbr.rel (!%p18_p4) target bundleno = 1 (0x1), region = 97 }

</bundles_post_ra>
